<compile_context>
chip_gen: v6e
topology: v6e:2x2x1
jax: 0.10.0
libtpu: 0.0.40
codegen_flags: <defaults>
</compile_context>

<pallas_src>
import functools

import jax
import jax.numpy as jnp
from jax.experimental import pallas as pl
from jax.experimental.pallas import tpu as pltpu

LANE = 128  # TPU lane width; hidden feature dims are padded to multiples.


def _round_up(n, m):
    return ((n + m - 1) // m) * m


def _choose_tm(batch, *, max_tm=1024, align=128):
    """Largest batch tile <= max_tm that still yields >= 2 grid steps when the
    batch allows it (keeps both v7x TensorCores busy) while amortizing the
    ~0.35us/step pipeline overhead with big tiles. Tiny batches get one tile."""
    if batch <= align:
        return align
    return min(max_tm, _round_up(pl.cdiv(batch, 2), align))


# ---------------------------------------------------------------------------
# Fused Pallas kernel: whole encoder + decoder for one batch tile
# ---------------------------------------------------------------------------
def _fused_ae_kernel(x_ref, *refs, activations, n_layers, n_encoder, p_code,
                     matmul_dtype):
    # refs layout: w0, b0, w1, b1, ..., w_{L-1}, b_{L-1}, out_ref
    wb_refs = refs[: 2 * n_layers]
    out_ref = refs[2 * n_layers]

    h = x_ref[...]                                # (tm, Din) bf16, no cast
    enc = None
    for li in range(n_layers):                    # static unroll (6 layers)
        w = wb_refs[2 * li][...]                  # (K, P_next), bf16
        b = wb_refs[2 * li + 1][...]              # (1, P_next), f32
        lhs = h if h.dtype == matmul_dtype else h.astype(matmul_dtype)
        y = jnp.dot(lhs, w, preferred_element_type=jnp.float32) + b
        act = activations[li]
        if act == "relu":
            h = jnp.maximum(y, 0.0)
        elif act == "sigmoid":
            h = jax.nn.sigmoid(y)
        else:
            h = y
        if li == n_encoder - 1:                   # bottleneck activations
            enc = h

    # One fused [encoded | decoded] output slab -> lane-aligned, unmasked
    # stores and a single output DMA per grid step.
    # NOTE: padded lanes hold sigmoid(0)=0.5; the wrapper slices them off, so
    # never feed the raw padded slab to a downstream consumer.
    out_ref[:, :p_code] = enc.astype(out_ref.dtype)
    out_ref[:, p_code:] = h.astype(out_ref.dtype)


# ---------------------------------------------------------------------------
# Wrapper: padding, BlockSpecs, single pallas_call
# ---------------------------------------------------------------------------
def autoencoder_forward(x, padded_layers, n_encoder, input_dim, code_dim, *,
                        tm=None, matmul_dtype=jnp.bfloat16):
    """Returns (encoded, decoded) with original (unpadded) feature widths."""
    B, Din = x.shape
    assert Din == input_dim
    n_layers = len(padded_layers)
    activations = tuple(a for _, _, a in padded_layers)

    P_code = padded_layers[n_encoder - 1][0].shape[1]
    P_out = padded_layers[-1][0].shape[1]
    P_slab = P_code + P_out

    if tm is None:
        tm = _choose_tm(B)
    Bp = _round_up(max(B, tm), tm)

    # Single fused pad + bf16 cast; feature dim stays at its true width
    # (full-array dims satisfy the (8,128) BlockSpec rule).
    x_bf = x.astype(matmul_dtype)
    xp = x_bf if Bp == B else (
        jnp.zeros((Bp, Din), matmul_dtype).at[:B].set(x_bf))

    kernel = functools.partial(
        _fused_ae_kernel,
        activations=activations,
        n_layers=n_layers,
        n_encoder=n_encoder,
        p_code=P_code,
        matmul_dtype=matmul_dtype,
    )

    in_specs = [pl.BlockSpec((tm, Din), lambda i: (i, 0))]   # streamed x tile
    flat_wb = []
    for w, b, _ in padded_layers:
        # Full weight / bias resident in VMEM, constant index_map (no re-DMA).
        in_specs.append(pl.BlockSpec(w.shape, lambda i: (0, 0)))
        in_specs.append(pl.BlockSpec(b.shape, lambda i: (0, 0)))
        flat_wb.extend([w, b])

    out_spec = pl.BlockSpec((tm, P_slab), lambda i: (i, 0))  # fused enc|dec

    slab = pl.pallas_call(
        kernel,
        out_shape=jax.ShapeDtypeStruct((Bp, P_slab), jnp.float32),
        grid_spec=pl.GridSpec(
            grid=(Bp // tm,),
            in_specs=in_specs,
            out_specs=out_spec,
        ),
        compiler_params=pltpu.CompilerParams(
            dimension_semantics=("parallel",),   # batch tiles are independent
        ),
    )(xp, *flat_wb)

    # Strip batch + lane padding.
    encoded = slab[:B, :code_dim]
    decoded = slab[:B, P_code:P_code + input_dim]
    return encoded, decoded


# ---------------------------------------------------------------------------
# Parameter construction (PyTorch nn.Linear-style init), plus lane padding
# ---------------------------------------------------------------------------
def _init_linear(key, in_dim, out_dim):
    k_w, k_b = jax.random.split(key)
    bound = 1.0 / jnp.sqrt(jnp.float32(in_dim))
    # Stored pre-transposed as (in, out) so the kernel computes x @ W.
    w = jax.random.uniform(k_w, (in_dim, out_dim), jnp.float32, -bound, bound)
    b = jax.random.uniform(k_b, (out_dim,), jnp.float32, -bound, bound)
    return w, b


def build_autoencoder_params(key, input_dim, hidden_dims, output_dim):
    """Returns (layers, n_encoder): layers = [(w_f32, b_f32, act), ...]."""
    enc_dims = [input_dim] + list(hidden_dims) + [output_dim]
    dec_dims = [output_dim] + list(reversed(hidden_dims)) + [input_dim]
    enc_acts = ["relu"] * len(hidden_dims) + ["sigmoid"]
    dec_acts = ["relu"] * len(hidden_dims) + ["sigmoid"]

    n_layers = (len(enc_dims) - 1) + (len(dec_dims) - 1)
    keys = jax.random.split(key, n_layers)

    layers = []
    k_idx = 0
    for din, dout, act in zip(enc_dims[:-1], enc_dims[1:], enc_acts):
        w, b = _init_linear(keys[k_idx], din, dout)
        layers.append((w, b, act))
        k_idx += 1
    n_encoder = len(layers)
    for din, dout, act in zip(dec_dims[:-1], dec_dims[1:], dec_acts):
        w, b = _init_linear(keys[k_idx], din, dout)
        layers.append((w, b, act))
        k_idx += 1
    return layers, n_encoder


def pad_params(layers, matmul_dtype=jnp.bfloat16):
    """Zero-pad layers to 128-lane-aligned output widths; weights stored bf16.

    Layer 0 keeps its TRUE input width (a full-dim BlockSpec is legal), so the
    streamed x needs no feature padding; every later layer's input width is
    the 128-lane-padded output width of the previous layer (padded rows are
    zero, so padded lanes never contribute to real outputs)."""
    padded = []
    for li, (w, b, act) in enumerate(layers):
        din, dout = w.shape
        pin = din if li == 0 else _round_up(din, LANE)
        pout = _round_up(dout, LANE)
        wp = jnp.zeros((pin, pout), matmul_dtype).at[:din, :dout].set(
            w.astype(matmul_dtype))
        bp = jnp.zeros((1, pout), jnp.float32).at[0, :dout].set(b)
        padded.append((wp, bp, act))
    return padded


# ---------------------------------------------------------------------------
# Pure-JAX references for correctness checking
# ---------------------------------------------------------------------------
def _ref_forward(x, layers, n_encoder, matmul_dtype=None):
    h = x.astype(jnp.float32)
    enc = None
    for i, (w, b, act) in enumerate(layers):
        if matmul_dtype is None:
            y = h @ w + b
        else:
            y = jnp.dot(h.astype(matmul_dtype), w.astype(matmul_dtype),
                        preferred_element_type=jnp.float32) + b
        h = jnp.maximum(y, 0.0) if act == "relu" else jax.nn.sigmoid(y)
        if i == n_encoder - 1:
            enc = h
    return enc, h


if __name__ == "__main__":
    # Small shapes consistent with the module's __init__ signature.
    batch = 200            # deliberately NOT a multiple of the tile -> padding
    input_dim = 64
    hidden_dims = [32, 16]
    output_dim = 8

    key = jax.random.PRNGKey(0)
    k_params, k_x = jax.random.split(key)

    layers, n_encoder = build_autoencoder_params(
        k_params, input_dim, hidden_dims, output_dim)
    padded_layers = pad_params(layers, matmul_dtype=jnp.bfloat16)

    x = jax.random.uniform(k_x, (batch, input_dim), jnp.float32)

    encoded, decoded = autoencoder_forward(
        x, padded_layers, n_encoder, input_dim, output_dim,
        matmul_dtype=jnp.bfloat16)
    jax.block_until_ready((encoded, decoded))

    assert encoded.shape == (batch, output_dim)
    assert decoded.shape == (batch, input_dim)

    # Tight check vs a reference that mirrors the bf16-matmul / f32-accumulate
    # numerics of the kernel.
    enc_bf, dec_bf = _ref_forward(x, layers, n_encoder,
                                  matmul_dtype=jnp.bfloat16)
    assert jnp.allclose(encoded, enc_bf, atol=2e-3, rtol=2e-3)
    assert jnp.allclose(decoded, dec_bf, atol=2e-3, rtol=2e-3)

    # Loose check vs the full-f32 PyTorch-semantics reference (bf16 rounding
    # of the matmul inputs is the only deviation).
    enc_f32, dec_f32 = _ref_forward(x, layers, n_encoder, matmul_dtype=None)
    assert jnp.allclose(encoded, enc_f32, atol=3e-2, rtol=3e-2)
    assert jnp.allclose(decoded, dec_f32, atol=3e-2, rtol=3e-2)

    print("KERNEL_OK")
</pallas_src>

<mosaic_0001>
module attributes {stable_mosaic.version = 11 : i64} {
  func.func @_fused_ae_kernel(%arg0: i32, %arg1: memref<128x64xbf16, #tpu.memory_space<vmem>>, %arg2: memref<64x128xbf16, #tpu.memory_space<vmem>>, %arg3: memref<1x128xf32, #tpu.memory_space<vmem>>, %arg4: memref<128x128xbf16, #tpu.memory_space<vmem>>, %arg5: memref<1x128xf32, #tpu.memory_space<vmem>>, %arg6: memref<128x128xbf16, #tpu.memory_space<vmem>>, %arg7: memref<1x128xf32, #tpu.memory_space<vmem>>, %arg8: memref<128x128xbf16, #tpu.memory_space<vmem>>, %arg9: memref<1x128xf32, #tpu.memory_space<vmem>>, %arg10: memref<128x128xbf16, #tpu.memory_space<vmem>>, %arg11: memref<1x128xf32, #tpu.memory_space<vmem>>, %arg12: memref<128x128xbf16, #tpu.memory_space<vmem>>, %arg13: memref<1x128xf32, #tpu.memory_space<vmem>>, %arg14: memref<128x256xf32, #tpu.memory_space<vmem>>) attributes {dimension_semantics = [#tpu.dimension_semantics<parallel>], iteration_bounds = array<i64: 2>, scalar_prefetch = 0 : i64, scratch_operands = 0 : i64, tpu.core_type = #tpu.core_type<tc>, window_params = [{transform_indices = @transform_0, window_bounds = array<i64: 128, 64>}, {pipeline_mode = #tpu.pipeline_mode<synchronous>, transform_indices = @transform_1, window_bounds = array<i64: 64, 128>}, {pipeline_mode = #tpu.pipeline_mode<synchronous>, transform_indices = @transform_2, window_bounds = array<i64: 1, 128>}, {pipeline_mode = #tpu.pipeline_mode<synchronous>, transform_indices = @transform_3, window_bounds = array<i64: 128, 128>}, {pipeline_mode = #tpu.pipeline_mode<synchronous>, transform_indices = @transform_4, window_bounds = array<i64: 1, 128>}, {pipeline_mode = #tpu.pipeline_mode<synchronous>, transform_indices = @transform_5, window_bounds = array<i64: 128, 128>}, {pipeline_mode = #tpu.pipeline_mode<synchronous>, transform_indices = @transform_6, window_bounds = array<i64: 1, 128>}, {pipeline_mode = #tpu.pipeline_mode<synchronous>, transform_indices = @transform_7, window_bounds = array<i64: 128, 128>}, {pipeline_mode = #tpu.pipeline_mode<synchronous>, transform_indices = @transform_8, window_bounds = array<i64: 1, 128>}, {pipeline_mode = #tpu.pipeline_mode<synchronous>, transform_indices = @transform_9, window_bounds = array<i64: 128, 128>}, {pipeline_mode = #tpu.pipeline_mode<synchronous>, transform_indices = @transform_10, window_bounds = array<i64: 1, 128>}, {pipeline_mode = #tpu.pipeline_mode<synchronous>, transform_indices = @transform_11, window_bounds = array<i64: 128, 128>}, {pipeline_mode = #tpu.pipeline_mode<synchronous>, transform_indices = @transform_12, window_bounds = array<i64: 1, 128>}, {transform_indices = @transform_13, window_bounds = array<i64: 128, 256>}]} {
    %c0 = arith.constant 0 : index
    %c0_0 = arith.constant 0 : index
    %0 = vector.load %arg1[%c0, %c0_0] : memref<128x64xbf16, #tpu.memory_space<vmem>>, vector<128x64xbf16>
    %c0_1 = arith.constant 0 : index
    %c0_2 = arith.constant 0 : index
    %1 = vector.load %arg2[%c0_1, %c0_2] : memref<64x128xbf16, #tpu.memory_space<vmem>>, vector<64x128xbf16>
    %c0_3 = arith.constant 0 : index
    %c0_4 = arith.constant 0 : index
    %2 = vector.load %arg3[%c0_3, %c0_4] : memref<1x128xf32, #tpu.memory_space<vmem>>, vector<1x128xf32>
    %cst = arith.constant dense<0.000000e+00> : vector<128x128xf32>
    %3 = tpu.matmul %0, %1, %cst {dimension_numbers = #tpu.dot_dimension_numbers<[1], [0], [0], [1], [0, 0, 1, 1], [], []>} : vector<128x64xbf16>, vector<64x128xbf16>, vector<128x128xf32> -> vector<128x128xf32>
    %4 = vector.broadcast %2 : vector<1x128xf32> to vector<128x128xf32>
    %5 = arith.addf %3, %4 : vector<128x128xf32>
    %cst_5 = arith.constant 0.000000e+00 : f32
    %6 = vector.broadcast %cst_5 : f32 to vector<128x128xf32>
    %7 = arith.maximumf %5, %6 : vector<128x128xf32>
    %c0_6 = arith.constant 0 : index
    %c0_7 = arith.constant 0 : index
    %8 = vector.load %arg4[%c0_6, %c0_7] : memref<128x128xbf16, #tpu.memory_space<vmem>>, vector<128x128xbf16>
    %c0_8 = arith.constant 0 : index
    %c0_9 = arith.constant 0 : index
    %9 = vector.load %arg5[%c0_8, %c0_9] : memref<1x128xf32, #tpu.memory_space<vmem>>, vector<1x128xf32>
    %10 = arith.truncf %7 : vector<128x128xf32> to vector<128x128xbf16>
    %cst_10 = arith.constant dense<0.000000e+00> : vector<128x128xf32>
    %11 = tpu.matmul %10, %8, %cst_10 {dimension_numbers = #tpu.dot_dimension_numbers<[1], [0], [0], [1], [0, 0, 1, 1], [], []>} : vector<128x128xbf16>, vector<128x128xbf16>, vector<128x128xf32> -> vector<128x128xf32>
    %12 = vector.broadcast %9 : vector<1x128xf32> to vector<128x128xf32>
    %13 = arith.addf %11, %12 : vector<128x128xf32>
    %cst_11 = arith.constant 0.000000e+00 : f32
    %14 = vector.broadcast %cst_11 : f32 to vector<128x128xf32>
    %15 = arith.maximumf %13, %14 : vector<128x128xf32>
    %c0_12 = arith.constant 0 : index
    %c0_13 = arith.constant 0 : index
    %16 = vector.load %arg6[%c0_12, %c0_13] : memref<128x128xbf16, #tpu.memory_space<vmem>>, vector<128x128xbf16>
    %c0_14 = arith.constant 0 : index
    %c0_15 = arith.constant 0 : index
    %17 = vector.load %arg7[%c0_14, %c0_15] : memref<1x128xf32, #tpu.memory_space<vmem>>, vector<1x128xf32>
    %18 = arith.truncf %15 : vector<128x128xf32> to vector<128x128xbf16>
    %cst_16 = arith.constant dense<0.000000e+00> : vector<128x128xf32>
    %19 = tpu.matmul %18, %16, %cst_16 {dimension_numbers = #tpu.dot_dimension_numbers<[1], [0], [0], [1], [0, 0, 1, 1], [], []>} : vector<128x128xbf16>, vector<128x128xbf16>, vector<128x128xf32> -> vector<128x128xf32>
    %20 = vector.broadcast %17 : vector<1x128xf32> to vector<128x128xf32>
    %21 = arith.addf %19, %20 : vector<128x128xf32>
    %22 = arith.negf %21 : vector<128x128xf32>
    %23 = math.exp %22 : vector<128x128xf32>
    %cst_17 = arith.constant 1.000000e+00 : f32
    %24 = vector.broadcast %cst_17 : f32 to vector<128x128xf32>
    %25 = arith.addf %24, %23 : vector<128x128xf32>
    %26 = arith.divf %24, %25 : vector<128x128xf32>
    %c0_18 = arith.constant 0 : index
    %c0_19 = arith.constant 0 : index
    %27 = vector.load %arg8[%c0_18, %c0_19] : memref<128x128xbf16, #tpu.memory_space<vmem>>, vector<128x128xbf16>
    %c0_20 = arith.constant 0 : index
    %c0_21 = arith.constant 0 : index
    %28 = vector.load %arg9[%c0_20, %c0_21] : memref<1x128xf32, #tpu.memory_space<vmem>>, vector<1x128xf32>
    %29 = arith.truncf %26 : vector<128x128xf32> to vector<128x128xbf16>
    %cst_22 = arith.constant dense<0.000000e+00> : vector<128x128xf32>
    %30 = tpu.matmul %29, %27, %cst_22 {dimension_numbers = #tpu.dot_dimension_numbers<[1], [0], [0], [1], [0, 0, 1, 1], [], []>} : vector<128x128xbf16>, vector<128x128xbf16>, vector<128x128xf32> -> vector<128x128xf32>
    %31 = vector.broadcast %28 : vector<1x128xf32> to vector<128x128xf32>
    %32 = arith.addf %30, %31 : vector<128x128xf32>
    %cst_23 = arith.constant 0.000000e+00 : f32
    %33 = vector.broadcast %cst_23 : f32 to vector<128x128xf32>
    %34 = arith.maximumf %32, %33 : vector<128x128xf32>
    %c0_24 = arith.constant 0 : index
    %c0_25 = arith.constant 0 : index
    %35 = vector.load %arg10[%c0_24, %c0_25] : memref<128x128xbf16, #tpu.memory_space<vmem>>, vector<128x128xbf16>
    %c0_26 = arith.constant 0 : index
    %c0_27 = arith.constant 0 : index
    %36 = vector.load %arg11[%c0_26, %c0_27] : memref<1x128xf32, #tpu.memory_space<vmem>>, vector<1x128xf32>
    %37 = arith.truncf %34 : vector<128x128xf32> to vector<128x128xbf16>
    %cst_28 = arith.constant dense<0.000000e+00> : vector<128x128xf32>
    %38 = tpu.matmul %37, %35, %cst_28 {dimension_numbers = #tpu.dot_dimension_numbers<[1], [0], [0], [1], [0, 0, 1, 1], [], []>} : vector<128x128xbf16>, vector<128x128xbf16>, vector<128x128xf32> -> vector<128x128xf32>
    %39 = vector.broadcast %36 : vector<1x128xf32> to vector<128x128xf32>
    %40 = arith.addf %38, %39 : vector<128x128xf32>
    %cst_29 = arith.constant 0.000000e+00 : f32
    %41 = vector.broadcast %cst_29 : f32 to vector<128x128xf32>
    %42 = arith.maximumf %40, %41 : vector<128x128xf32>
    %c0_30 = arith.constant 0 : index
    %c0_31 = arith.constant 0 : index
    %43 = vector.load %arg12[%c0_30, %c0_31] : memref<128x128xbf16, #tpu.memory_space<vmem>>, vector<128x128xbf16>
    %c0_32 = arith.constant 0 : index
    %c0_33 = arith.constant 0 : index
    %44 = vector.load %arg13[%c0_32, %c0_33] : memref<1x128xf32, #tpu.memory_space<vmem>>, vector<1x128xf32>
    %45 = arith.truncf %42 : vector<128x128xf32> to vector<128x128xbf16>
    %cst_34 = arith.constant dense<0.000000e+00> : vector<128x128xf32>
    %46 = tpu.matmul %45, %43, %cst_34 {dimension_numbers = #tpu.dot_dimension_numbers<[1], [0], [0], [1], [0, 0, 1, 1], [], []>} : vector<128x128xbf16>, vector<128x128xbf16>, vector<128x128xf32> -> vector<128x128xf32>
    %47 = vector.broadcast %44 : vector<1x128xf32> to vector<128x128xf32>
    %48 = arith.addf %46, %47 : vector<128x128xf32>
    %49 = arith.negf %48 : vector<128x128xf32>
    %50 = math.exp %49 : vector<128x128xf32>
    %cst_35 = arith.constant 1.000000e+00 : f32
    %51 = vector.broadcast %cst_35 : f32 to vector<128x128xf32>
    %52 = arith.addf %51, %50 : vector<128x128xf32>
    %53 = arith.divf %51, %52 : vector<128x128xf32>
    %c0_36 = arith.constant 0 : index
    %c0_37 = arith.constant 0 : index
    %54 = vector.load %arg14[%c0_36, %c0_37] : memref<128x256xf32, #tpu.memory_space<vmem>>, vector<128x128xf32>
    tpu.vector_store %arg14[%c0_36, %c0_37], %26 {strides = array<i32>} : memref<128x256xf32, #tpu.memory_space<vmem>>, vector<128x128xf32>,
    %c0_38 = arith.constant 0 : index
    %c128 = arith.constant 128 : index
    %55 = vector.load %arg14[%c0_38, %c128] : memref<128x256xf32, #tpu.memory_space<vmem>>, vector<128x128xf32>
    tpu.vector_store %arg14[%c0_38, %c128], %53 {strides = array<i32>} : memref<128x256xf32, #tpu.memory_space<vmem>>, vector<128x128xf32>,
    return
  }
  func.func @transform_0(%arg0: i32) -> (i32, i32) {
    %c0_i32 = arith.constant 0 : i32
    %c0_i32_0 = arith.constant 0 : i32
    return %arg0, %c0_i32 : i32, i32
  }
  func.func @transform_1(%arg0: i32) -> (i32, i32) {
    %c0_i32 = arith.constant 0 : i32
    %c0_i32_0 = arith.constant 0 : i32
    %c0_i32_1 = arith.constant 0 : i32
    return %c0_i32, %c0_i32_0 : i32, i32
  }
  func.func @transform_2(%arg0: i32) -> (i32, i32) {
    %c0_i32 = arith.constant 0 : i32
    %c0_i32_0 = arith.constant 0 : i32
    %c0_i32_1 = arith.constant 0 : i32
    return %c0_i32, %c0_i32_0 : i32, i32
  }
  func.func @transform_3(%arg0: i32) -> (i32, i32) {
    %c0_i32 = arith.constant 0 : i32
    %c0_i32_0 = arith.constant 0 : i32
    %c0_i32_1 = arith.constant 0 : i32
    return %c0_i32, %c0_i32_0 : i32, i32
  }
  func.func @transform_4(%arg0: i32) -> (i32, i32) {
    %c0_i32 = arith.constant 0 : i32
    %c0_i32_0 = arith.constant 0 : i32
    %c0_i32_1 = arith.constant 0 : i32
    return %c0_i32, %c0_i32_0 : i32, i32
  }
  func.func @transform_5(%arg0: i32) -> (i32, i32) {
    %c0_i32 = arith.constant 0 : i32
    %c0_i32_0 = arith.constant 0 : i32
    %c0_i32_1 = arith.constant 0 : i32
    return %c0_i32, %c0_i32_0 : i32, i32
  }
  func.func @transform_6(%arg0: i32) -> (i32, i32) {
    %c0_i32 = arith.constant 0 : i32
    %c0_i32_0 = arith.constant 0 : i32
    %c0_i32_1 = arith.constant 0 : i32
    return %c0_i32, %c0_i32_0 : i32, i32
  }
  func.func @transform_7(%arg0: i32) -> (i32, i32) {
    %c0_i32 = arith.constant 0 : i32
    %c0_i32_0 = arith.constant 0 : i32
    %c0_i32_1 = arith.constant 0 : i32
    return %c0_i32, %c0_i32_0 : i32, i32
  }
  func.func @transform_8(%arg0: i32) -> (i32, i32) {
    %c0_i32 = arith.constant 0 : i32
    %c0_i32_0 = arith.constant 0 : i32
    %c0_i32_1 = arith.constant 0 : i32
    return %c0_i32, %c0_i32_0 : i32, i32
  }
  func.func @transform_9(%arg0: i32) -> (i32, i32) {
    %c0_i32 = arith.constant 0 : i32
    %c0_i32_0 = arith.constant 0 : i32
    %c0_i32_1 = arith.constant 0 : i32
    return %c0_i32, %c0_i32_0 : i32, i32
  }
  func.func @transform_10(%arg0: i32) -> (i32, i32) {
    %c0_i32 = arith.constant 0 : i32
    %c0_i32_0 = arith.constant 0 : i32
    %c0_i32_1 = arith.constant 0 : i32
    return %c0_i32, %c0_i32_0 : i32, i32
  }
  func.func @transform_11(%arg0: i32) -> (i32, i32) {
    %c0_i32 = arith.constant 0 : i32
    %c0_i32_0 = arith.constant 0 : i32
    %c0_i32_1 = arith.constant 0 : i32
    return %c0_i32, %c0_i32_0 : i32, i32
  }
  func.func @transform_12(%arg0: i32) -> (i32, i32) {
    %c0_i32 = arith.constant 0 : i32
    %c0_i32_0 = arith.constant 0 : i32
    %c0_i32_1 = arith.constant 0 : i32
    return %c0_i32, %c0_i32_0 : i32, i32
  }
  func.func @transform_13(%arg0: i32) -> (i32, i32) {
    %c0_i32 = arith.constant 0 : i32
    %c0_i32_0 = arith.constant 0 : i32
    return %arg0, %c0_i32 : i32, i32
  }
}

</mosaic_0001>

<bundles_post_ra>
// kernel: tpu_custom_call.1
= control target key start
LH: loop header
LB: loop body
LE: loop exit
PB: predicated region body
PF: predicated region fallthrough
CT: control target
= control target key end

     0   :  { %18 = vsyncpa [#allocation3], 0  ;;  %s3210_s0 = inlined_call_operand.vmem [shape: bf16[256,64], index: 0, kind: input, shape index: {}]   ;;  %s3211_s1 = inlined_call_operand.hbm [shape: bf16[64,128], index: 1, kind: input, shape index: {}]   ;;  %s3212_s2 = inlined_call_operand.vmem [shape: f32[1,128], index: 2, kind: input, shape index: {}]   ;;  %s3213_s3 = inlined_call_operand.vmem [shape: bf16[128,128], index: 3, kind: input, shape index: {}]   ;;  %s3214_s4 = inlined_call_operand.vmem [shape: f32[1,128], index: 4, kind: input, shape index: {}]   ;;  %s3215_s5 = inlined_call_operand.vmem [shape: bf16[128,128], index: 5, kind: input, shape index: {}]   ;;  %s3216_s6 = inlined_call_operand.vmem [shape: f32[1,128], index: 6, kind: input, shape index: {}]   ;;  %s3217_s7 = inlined_call_operand.vmem [shape: bf16[128,128], index: 7, kind: input, shape index: {}]   ;;  %s3218_s8 = inlined_call_operand.vmem [shape: f32[1,128], index: 8, kind: input, shape index: {}]   ;;  %s3219_s9 = inlined_call_operand.hbm [shape: bf16[128,128], index: 9, kind: input, shape index: {}]   ;;  %s3220_s10 = inlined_call_operand.vmem [shape: f32[1,128], index: 10, kind: input, shape index: {}]   ;;  %s3221_s11 = inlined_call_operand.hbm [shape: bf16[128,128], index: 11, kind: input, shape index: {}]   ;;  %s3222_s12 = inlined_call_operand.vmem [shape: f32[1,128], index: 12, kind: input, shape index: {}]   ;;  %s3223_s13 = inlined_call_operand.hbm [shape: f32[256,256], index: 13, kind: output, shape index: {}]  }
   0x1   :  { %19 = vsyncpa [#allocation6], 0 }
   0x2   :  { %20 = vsyncpa [#allocation4], 0 }
   0x3   :  { %22 = vsyncpa [#allocation4 + $0x1], 0  ;;  %s2871_s25 = smov 0   ;;  %s2873_s26 = smov 0  }
   0x4   :  { %s2875_s27 = smov 0   ;;  %s2877_s28 = smov 0  }
   0x5 LB: > { %3230 = sst [smem:[#allocation12_spill]] %s2787_s27  ;;  %s2892_s29 = sadd.s32 4294967295, %s2791_s28   ;;  %s2791_s28 = sphi %s2877_s28, %s3245_s28   ;;  %s2787_s27 = sphi %s2875_s27, %s3247_s27   ;;  %s2783_s26 = sphi %s2873_s26, %s3249_s26   ;;  %s2779_s25 = sphi %s2871_s25, %s3248_s25  }
   0x6   : > { %s1980_s30 = sadd.s32 4294967294, %s2791_s28   ;;  %s2896_s14 = sadd.s32 1, %s2791_s28  }
   0x7   : > { %3231 = sst [smem:[#allocation13_spill]] %s2896_s14  ;;  %s313_s15 = sadd.s32 1, %s2787_s27 }
   0x8   : > { %s310_s16 = ssub.s32 %s2791_s28, %s2896_s14  ;;  %p323_p0 = scmp.ne.s32.totalorder %s2787_s27, %s2783_s26 }
   0x9   : > { %p311_p1 = scmp.eq.s32.totalorder %s310_s16, 0  ;;  %p324_p2 = scmp.eq.s32.totalorder %s2892_s29, 1 }
   0xa   : > { %p329_p3 = scmp.ne.s32.totalorder %s2783_s26, %s2779_s25  ;;  %p330_p4 = scmp.eq.s32.totalorder %s1980_s30, 1 }
   0xb   : > { %s2907_s17 = scalar_select %p311_p1, %s2787_s27, %s313_s15  }
   0xc   : > { %p2909_p5 = por %p324_p2, %p323_p0  ;;  %p2913_p6 = por %p330_p4, %p329_p3 }
   0xd   : > { %3232 = sst [smem:[#allocation14_spill]] %s2907_s17  ;;  %p1981_p7 = scmp.ge.s32.totalorder %s2791_s28, 1 }
   0xe   : > { %s3233_s18 = scalar_select %p2909_p5, 1, 0 }
   0xf   : > { %s3234_s19 = scalar_select %p2913_p6, 1, 0 }
  0x10   : > { %p337_p8 = scmp.lt.s32.totalorder %s2791_s28, 3  ;;  %p3227_p9 = scmp.eq.s32.totalorder %s2892_s29, 0 }
  0x11   : > { %3235 = sst [smem:[#allocation15_spill]] %s3234_s19  ;;  %s2793_s21 = smov [#allocation5]  }
  0x12   : > { %p2920_p10 = pnand %p1981_p7, %p337_p8  ;;  %s383_s22 = sshll.u32 %s2793_s21, 4  ;;  %s384_s22 = int_to_ptr.vmem [resolvable:$true] %s383_s22 }
  0x13   : > { %s2794_s24 = smov [#allocation2]   ;;  %s2795_s15 = smov [#allocation7]  }
  0x14   : > { %p2405_p11 = pneg %p2920_p10  ;;  %s349_s30 = sshll.u32 %s2794_s24, 4  ;;  %s350_s30 = int_to_ptr.vmem [resolvable:$true] %s349_s30 }
  0x15   : > { %s399_s16 = sshll.u32 %s2795_s15, 4  ;;  %s2656_s17 = scalar_lea.vmem %s384_s22, 1024  ;;  %s400_s16 = int_to_ptr.vmem [resolvable:$true] %s399_s16 }
  0x16   : > { %p2928_p12 = pnand %p3227_p9, %p2405_p11  ;;  %p2657_p0 = scmp.ne.s32.totalorder %s384_s22, %s2656_s17 }
  0x17   : > { %p2664_p3 = scmp.lt.s32.totalorder %s384_s22, %s384_s22  ;;  %p2665_p4 = scmp.lt.s32.totalorder %s2656_s17, %s2656_s17 }
  0x18   : > { %p2647_p13 = pneg %p2928_p12 }
  0x19   : > { %p2666_p7 = por %p2665_p4, %p2664_p3 }
  0x1a   : > { %p2659_p1 = pnand %p2657_p0, %p2647_p13 }
  0x1c   : > { %p2660_p2 = pneg %p2659_p1 }
  0x1e   : > { %p2667_p8 = pnand %p2666_p7, %p2660_p2 }
  0x20   : > { %2670 = shalt.err (!%p2667_p8)
}
  0x21   : > { %s2796_s21 = smov 64   ;;  %s2797_s24 = smov 4  }
  0x22   : > { %2411 = dma.hbm_to_vmem [thread:$0]  (!%p2928_p12), %s3219_s9, 1024, %s384_s22, [#allocation6], %s2796_s21, %s2796_s21, %s2797_s24  }
  0x23   : > { %s2682_s14 = scalar_lea.vmem %s350_s30, 512  ;;  %p2690_p9 = scmp.lt.s32.totalorder %s350_s30, %s350_s30 }
  0x24   : > { %p2683_p11 = scmp.ne.s32.totalorder %s350_s30, %s2682_s14  ;;  %p2691_p6 = scmp.lt.s32.totalorder %s2682_s14, %s2682_s14 }
  0x26   : > { %p2685_p0 = pnand %p2683_p11, %p2647_p13  ;;  %p2692_p3 = por %p2691_p6, %p2690_p9 }
  0x28   : > { %p2686_p1 = pneg %p2685_p0 }
  0x2a   : > { %p2693_p2 = pnand %p2692_p3, %p2686_p1 }
  0x2c   : > { %2696 = shalt.err (!%p2693_p2)
}
  0x2d   : > { %2408 = dma.hbm_to_vmem [thread:$0]  (!%p2928_p12), %s3211_s1, 512, %s350_s30, [#allocation3], %s2796_s21, %s2796_s21, %s2797_s24  }
  0x2e   : > { %s2708_s27 = scalar_lea.vmem %s400_s16, 1024  ;;  %p2716_p11 = scmp.lt.s32.totalorder %s400_s16, %s400_s16 }
  0x2f   : > { %p2709_p4 = scmp.ne.s32.totalorder %s400_s16, %s2708_s27  ;;  %p2717_p0 = scmp.lt.s32.totalorder %s2708_s27, %s2708_s27 }
  0x31   : > { %p2711_p7 = pnand %p2709_p4, %p2647_p13  ;;  %p2718_p5 = por %p2717_p0, %p2716_p11 }
  0x33   : > { %p2712_p8 = pneg %p2711_p7 }
  0x35   : > { %p2719_p6 = pnand %p2718_p5, %p2712_p8 }
  0x37   : > { %2722 = shalt.err (!%p2719_p6)
}
  0x38   : > { %2414 = dma.hbm_to_vmem [thread:$0]  (!%p2928_p12), %s3221_s11, 1024, %s400_s16, [#allocation6], %s2796_s21, %s2796_s21, %s2797_s24  }
  0x39   : > { %427 = sbr.rel (%p2920_p10) target bundleno = 1415 (0x587), region = 72  ;;  %p3238_p9 = scmp.eq.s32.totalorder (!%p2920_p10), %s2892_s29, 0 }
  0x3e   : > { %2766 = dma.done.wait (%p3238_p9), [#allocation3], 512   ;;  %p3239_p13 = pmov %p3238_p9 }
  0x3f   : > { %p3240_p1 = pmov %p3238_p9 }
  0x40   : > { %2768 = vsyncadd (%p3239_p13), [#allocation3], 4294966784 }
  0x41   : > { %2770 = dma.done.wait (%p3240_p1), [#allocation6], 2048   ;;  %p3241_p5 = pmov %p3240_p1 }
  0x42   : > { %s1991_s19 = sshll.u32 %s2892_s29, 4  ;;  %v2465_v0 = vld [vmem:[#allocation2 + $0x18] sm:$0xff]   ;;  %v2466_v1 = vld [vmem:[#allocation2 + $0x10] sm:$0xff]   ;;  %v2467_v2 = vld [vmem:[#allocation2 + $0x8] sm:$0xff]   ;;  %vm582_vm0 = vcmask 523264   ;;  %s476_s22 = sand.u32 1, %s2783_s26  }
  0x43   : > { %2772 = vsyncadd (%p3241_p5), [#allocation6], 4294965248  ;;  %p480_p3 = scmp.lt.s32.totalorder %s1991_s19, 31  ;;  %2191 = vmatprep.subr.bf16.mxu0 %v2465_v0  ;;  %v2468_v4 = vld [vmem:[#allocation2] sm:$0xff]   ;;  %v2477_v5 = vld [vmem:[%s3213_s3 + $0x38] sm:$0xff]   ;;  %s2098_s27 = sshll.u32 %s2892_s29, 12 }
  0x44   : > { %2192 = vmatpush3.bf16.msra.mxu0 %v2465_v0  ;;  %v2478_v6 = vld [vmem:[%s3213_s3 + $0x30] sm:$0xff]   ;;  %2215 = vmatprep.subr.bf16.mxu1 %v2477_v5  ;;  %v2479_v9 = vld [vmem:[%s3213_s3 + $0x28] sm:$0xff]   ;;  %v2480_v10 = vld [vmem:[%s3213_s3 + $0x20] sm:$0xff]   ;;  %s3162_s20 = scalar_lea.hbm %s3223_s13, %s2098_s27  ;;  %s3170_s30 = scalar_lea.sflag [#allocation4], %s476_s22 }
  0x45   : > { %s3251_s19 = smov (!%p480_p3, %s1991_s19), 31  ;;  %2193 = vmatprep.subr.bf16.mxu0 %v2466_v1  ;;  %2216 = vmatpush3.bf16.msra.mxu1 %v2477_v5  ;;  %v2481_v13 = vld [vmem:[%s3213_s3 + $0x18] sm:$0xff]   ;;  %v2482_v17 = vld [vmem:[%s3213_s3 + $0x10] sm:$0xff]   ;;  %v2483_v18 = vld [vmem:[%s3213_s3 + $0x8] sm:$0xff]   ;;  %p3242_p12 = scmp.ne.s32.totalorder %s3233_s18, 0 }
  0x46   : > { %s1992_s23 = sshll.u32 %s3251_s19, 2  ;;  %2217 = vmatprep.subr.bf16.mxu1 %v2478_v6  ;;  %v2484_v19 = vld [vmem:[%s3213_s3] sm:$0xff]   ;;  %v2485_v20 = vld [vmem:[%s3215_s5 + $0x38] sm:$0xff]   ;;  %v2486_v21 = vld [vmem:[%s3215_s5 + $0x30] sm:$0xff]   ;;  %s1990_s19 = sshll.u32 %s476_s22, 8 }
  0x47   : > { %s2972_s16 = scalar_lea.vmem %s3210_s0, %s1992_s23  ;;  %v2487_v22 = vld [vmem:[%s3215_s5 + $0x28] sm:$0xff]   ;;  %v2488_v23 = vld [vmem:[%s3215_s5 + $0x20] sm:$0xff]   ;;  %v2489_v24 = vld [vmem:[%s3215_s5 + $0x18] sm:$0xff]   ;;  %s3092_s23 = scalar_lea.vmem [#allocation8], %s1990_s19 }
  0x48   : > { %v2469_v3 = vld [vmem:[%s2972_s16] sm:$0xff]   ;;  %2194 = vmatpush3.bf16.msra.mxu0 %v2466_v1  ;;  %v2470_v7 = vld [vmem:[%s2972_s16 + $0x8] sm:$0xff]   ;;  %v2471_v8 = vld [vmem:[%s2972_s16 + $0x10] sm:$0xff]   ;;  %s2798_s21 = smov [#allocation8]  }
  0x49   : > { %2199 = vmatprep.mubr.msk.bf16.mxu0 %vm582_vm0, %v2469_v3  ;;  %2195 = vmatprep.subr.bf16.mxu0 %v2467_v2  ;;  %v2472_v11 = vld [vmem:[%s2972_s16 + $0x18] sm:$0xff]   ;;  %v2473_v12 = vld [vmem:[%s2972_s16 + $0x20] sm:$0xff]   ;;  %v2474_v14 = vld [vmem:[%s2972_s16 + $0x28] sm:$0xff]   ;;  %s2727_s24 = sshll.u32 %s2798_s21, 4  ;;  %s2728_s24 = int_to_ptr.vmem [resolvable:$false] %s2727_s24 }
  0x4a   : > { %2218 = vmatpush3.bf16.msra.mxu1 %v2478_v6  ;;  %v2475_v15 = vld [vmem:[%s2972_s16 + $0x30] sm:$0xff]   ;;  %v2476_v16 = vld [vmem:[%s2972_s16 + $0x38] sm:$0xff]   ;;  %v1993_v27 = vld [vmem:[%s3212_s2] ss:$0 sm:$0xff]  ;;  %s1887_s16 = sshll.u32 %s3092_s23, 4  ;;  %s2729_s15 = scalar_lea.vmem %s2728_s24, 8192  ;;  %s3164_s16 = int_to_ptr.vmem [resolvable:$true] %s1887_s16 }
  0x4b   : > { %2219 = vmatprep.subr.bf16.mxu1 %v2479_v9  ;;  %s2723_s29 = scalar_lea.vmem %s3164_s16, 4096  ;;  %p2730_p7 = scmp.lt.s32.totalorder %s3164_s16, %s2728_s24 }
  0x4c   : > { %2196 = vmatpush3.bf16.msra.mxu0 %v2467_v2  ;;  %p2724_p10 = scmp.ne.s32.totalorder %s3164_s16, %s2723_s29  ;;  %p2731_p8 = scmp.lt.s32.totalorder %s2729_s15, %s2723_s29 }
  0x4d   : > { %2197 = vmatprep.subr.bf16.mxu0 %v2468_v4 }
  0x4e   : > { %2220 = vmatpush3.bf16.msra.mxu1 %v2479_v9  ;;  %p2725_p2 = pnand %p2724_p10, %p3242_p12  ;;  %p2732_p11 = por %p2731_p8, %p2730_p7 }
  0x4f   : > { %2221 = vmatprep.subr.bf16.mxu1 %v2480_v10 }
  0x50   : > { %2198 = vmatpush3.bf16.msra.mxu0 %v2468_v4  ;;  %p2726_p4 = pneg %p2725_p2 }
  0x51   : > { %2247 = vmatprep.subr.bf16.mxu0 %v2485_v20 }
  0x52   : > { %2222 = vmatpush3.bf16.msra.mxu1 %v2480_v10  ;;  %p2733_p0 = pnand %p2732_p11, %p2726_p4 }
  0x53   : > { %2200 = vmatmul.mubr.msk.bf16.vlgmr.msra.gmra.mxu0 %vm582_vm0, %v2470_v7  ;;  %2223 = vmatprep.subr.bf16.mxu1 %v2481_v13 }
  0x54   : > { %2203 = vmatprep.mubr.msk.bf16.mxu0 %vm582_vm0, %v2471_v8  ;;  %2248 = vmatpush3.bf16.msra.mxu0 %v2485_v20  ;;  %v2492_v20 = vld [vmem:[%s3215_s5] sm:$0xff]  }
  0x55   : > { %2249 = vmatprep.subr.bf16.mxu0 %v2486_v21 }
  0x56   : > { %2224 = vmatpush3.bf16.msra.mxu1 %v2481_v13 }
  0x57   : > { %2225 = vmatprep.subr.bf16.mxu1 %v2482_v17 }
  0x58   : > { %2250 = vmatpush3.bf16.msra.mxu0 %v2486_v21 }
  0x59   : > { %2251 = vmatprep.subr.bf16.mxu0 %v2487_v22 }
  0x5a   : > { %2226 = vmatpush3.bf16.msra.mxu1 %v2482_v17 }
  0x5b   : > { %2204 = vmatmul.mubr.msk.bf16.gmra.mxu0 %vm582_vm0, %v2472_v11  ;;  %2227 = vmatprep.subr.bf16.mxu1 %v2483_v18 }
  0x5c   : > { %2207 = vmatprep.mubr.msk.bf16.mxu0 %vm582_vm0, %v2473_v12  ;;  %2252 = vmatpush3.bf16.msra.mxu0 %v2487_v22 }
  0x5d   : > { %2253 = vmatprep.subr.bf16.mxu0 %v2488_v23 }
  0x5e   : > { %2228 = vmatpush3.bf16.msra.mxu1 %v2483_v18  ;;  %v2490_v18 = vld [vmem:[%s3215_s5 + $0x10] sm:$0xff]  }
  0x5f   : > { %2229 = vmatprep.subr.bf16.mxu1 %v2484_v19 }
  0x60   : > { %2254 = vmatpush3.bf16.msra.mxu0 %v2488_v23  ;;  %v2014_v23 = vld [vmem:[%s3214_s4] ss:$0 sm:$0xff] }
  0x61   : > { %2255 = vmatprep.subr.bf16.mxu0 %v2489_v24 }
  0x62   : > { %2230 = vmatpush3.bf16.msra.mxu1 %v2484_v19  ;;  %v2491_v19 = vld [vmem:[%s3215_s5 + $0x8] sm:$0xff]  }
  0x63   : > { %2208 = vmatmul.mubr.msk.bf16.gmra.mxu0 %vm582_vm0, %v2474_v14 }
  0x64   : > { %2211 = vmatprep.mubr.msk.bf16.mxu0 %vm582_vm0, %v2475_v15  ;;  %2256 = vmatpush3.bf16.msra.mxu0 %v2489_v24 }
  0x65   : > { %2257 = vmatprep.subr.bf16.mxu0 %v2490_v18 }
  0x68   : > { %2258 = vmatpush3.bf16.msra.mxu0 %v2490_v18  ;;  %v2497_v18 = vld [vmem:[%s3217_s7 + $0x18] sm:$0xff]  }
  0x69   : > { %2259 = vmatprep.subr.bf16.mxu0 %v2491_v19 }
  0x6b   : > { %2212 = vmatmul.mubr.msk.bf16.gmra.mxu0 %vm582_vm0, %v2476_v16 }
  0x6c   : > { %2260 = vmatpush3.bf16.msra.mxu0 %v2491_v19  ;;  %v2498_v19 = vld [vmem:[%s3217_s7 + $0x10] sm:$0xff]  }
  0x6d   : > { %2261 = vmatprep.subr.bf16.mxu0 %v2492_v20 }
  0x70   : > { %2262 = vmatpush3.bf16.msra.mxu0 %v2492_v20  ;;  %v2499_v20 = vld [vmem:[%s3217_s7 + $0x8] sm:$0xff]  }
 0x113   : > { %v2201_v25 = vpop.f32.mrf.mxu0 }
 0x114   : > { %v650_v31 = vadd.f32 %v2201_v25, %v1993_v27 }
 0x115   : > { %v641_v26 = vpop.f32.mrf.mxu0 }
 0x116   : > { %v642_v29 = vadd.f32 %v1993_v27, %v641_v26  ;;  %v706_v38 = vmax.f32 %v650_v31, 0.0 }
 0x117   : > { %v2202_v28 = vpop.f32.mrf.mxu0 }
 0x118   : > { %v653_v30 = vadd.f32 %v2202_v28, %v1993_v27  ;;  %v704_v36 = vmax.f32 %v642_v29, 0.0 }
 0x119   : > { %v644_v32 = vpop.f32.mrf.mxu0 }
 0x11a   : > { %v645_v33 = vadd.f32 %v1993_v27, %v644_v32  ;;  %v707_v34 = vmax.f32 %v653_v30, 0.0 }
 0x11b   : > { %v2205_v35 = vpop.f32.mrf.mxu0 }
 0x11c   : > { %v705_v37 = vmax.f32 %v645_v33, 0.0  ;;  %v738_v41 = vpack.c.bf16 %v707_v34, %v706_v38  ;;  %v666_v45 = vadd.f32 %v2205_v35, %v1993_v27 }
 0x11d   : > { %v657_v39 = vpop.f32.mrf.mxu0 }
 0x11e   : > { %v737_v40 = vpack.c.bf16 %v705_v37, %v704_v36  ;;  %v658_v43 = vadd.f32 %v1993_v27, %v657_v39  ;;  %v710_v52 = vmax.f32 %v666_v45, 0.0 }
 0x11f   : > { %v2206_v42 = vpop.f32.mrf.mxu0 }
 0x120   : > { %v669_v44 = vadd.f32 %v2206_v42, %v1993_v27  ;;  %2231 = vmatprep.mubr.bf16.mxu1 %v737_v40  ;;  %v708_v50 = vmax.f32 %v658_v43, 0.0 }
 0x121   : > { %v660_v46 = vpop.f32.mrf.mxu0  ;;  %2232 = vmatmul.mubr.bf16.vlgmr.msra.gmra.mxu1 %v738_v41 }
 0x122   : > { %v661_v47 = vadd.f32 %v1993_v27, %v660_v46  ;;  %v711_v48 = vmax.f32 %v669_v44, 0.0 }
 0x123   : > { %v2209_v49 = vpop.f32.mrf.mxu0 }
 0x124   : > { %v709_v51 = vmax.f32 %v661_v47, 0.0  ;;  %v740_v55 = vpack.c.bf16 %v711_v48, %v710_v52  ;;  %v682_v59 = vadd.f32 %v2209_v49, %v1993_v27 }
 0x125   : > { %v673_v53 = vpop.f32.mrf.mxu0 }
 0x126   : > { %v739_v54 = vpack.c.bf16 %v709_v51, %v708_v50  ;;  %v674_v57 = vadd.f32 %v1993_v27, %v673_v53  ;;  %v714_v2 = vmax.f32 %v682_v59, 0.0 }
 0x127   : > { %v2210_v56 = vpop.f32.mrf.mxu0 }
 0x128   : > { %v685_v58 = vadd.f32 %v2210_v56, %v1993_v27  ;;  %2235 = vmatprep.mubr.bf16.mxu1 %v739_v54  ;;  %v712_v0 = vmax.f32 %v674_v57, 0.0 }
 0x129   : > { %v676_v60 = vpop.f32.mrf.mxu0  ;;  %2236 = vmatmul.mubr.bf16.gmra.mxu1 %v740_v55 }
 0x12a   : > { %v677_v61 = vadd.f32 %v1993_v27, %v676_v60  ;;  %v715_v62 = vmax.f32 %v685_v58, 0.0 }
 0x12b   : > { %v2213_v63 = vpop.f32.mrf.mxu0 }
 0x12c   : > { %v713_v1 = vmax.f32 %v677_v61, 0.0  ;;  %v742_v5 = vpack.c.bf16 %v715_v62, %v714_v2  ;;  %v698_v9 = vadd.f32 %v2213_v63, %v1993_v27 }
 0x12d   : > { %v689_v3 = vpop.f32.mrf.mxu0 }
 0x12e   : > { %v741_v4 = vpack.c.bf16 %v713_v1, %v712_v0  ;;  %v690_v7 = vadd.f32 %v1993_v27, %v689_v3  ;;  %v718_v15 = vmax.f32 %v698_v9, 0.0 }
 0x12f   : > { %v2214_v6 = vpop.f32.mrf.mxu0 }
 0x130   : > { %v701_v8 = vadd.f32 %v2214_v6, %v1993_v27  ;;  %2239 = vmatprep.mubr.bf16.mxu1 %v741_v4  ;;  %v716_v13 = vmax.f32 %v690_v7, 0.0 }
 0x131   : > { %v692_v10 = vpop.f32.mrf.mxu0  ;;  %2240 = vmatmul.mubr.bf16.gmra.mxu1 %v742_v5 }
 0x132   : > { %v693_v11 = vadd.f32 %v1993_v27, %v692_v10  ;;  %v719_v12 = vmax.f32 %v701_v8, 0.0 }
 0x134   : > { %v717_v14 = vmax.f32 %v693_v11, 0.0  ;;  %v744_v17 = vpack.c.bf16 %v719_v12, %v718_v15  ;;  %v2494_v15 = vld [vmem:[%s3217_s7 + $0x30] sm:$0xff]  }
 0x136   : > { %v743_v16 = vpack.c.bf16 %v717_v14, %v716_v13  ;;  %v2493_v14 = vld [vmem:[%s3217_s7 + $0x38] sm:$0xff]  }
 0x137   : > { %2279 = vmatprep.subr.bf16.mxu1 %v2493_v14 }
 0x138   : > { %2243 = vmatprep.mubr.bf16.mxu1 %v743_v16  ;;  %2280 = vmatpush3.bf16.msra.mxu1 %v2493_v14  ;;  %v2495_v16 = vld [vmem:[%s3217_s7 + $0x28] sm:$0xff]  }
 0x139   : > { %2244 = vmatmul.mubr.bf16.gmra.mxu1 %v744_v17  ;;  %2281 = vmatprep.subr.bf16.mxu1 %v2494_v15  ;;  %v2496_v17 = vld [vmem:[%s3217_s7 + $0x20] sm:$0xff]  }
 0x13c   : > { %2282 = vmatpush3.bf16.msra.mxu1 %v2494_v15 }
 0x13d   : > { %2283 = vmatprep.subr.bf16.mxu1 %v2495_v16 }
 0x140   : > { %2284 = vmatpush3.bf16.msra.mxu1 %v2495_v16 }
 0x141   : > { %2285 = vmatprep.subr.bf16.mxu1 %v2496_v17 }
 0x144   : > { %2286 = vmatpush3.bf16.msra.mxu1 %v2496_v17 }
 0x145   : > { %2287 = vmatprep.subr.bf16.mxu1 %v2497_v18 }
 0x148   : > { %2288 = vmatpush3.bf16.msra.mxu1 %v2497_v18 }
 0x149   : > { %2289 = vmatprep.subr.bf16.mxu1 %v2498_v19 }
 0x14c   : > { %2290 = vmatpush3.bf16.msra.mxu1 %v2498_v19 }
 0x14d   : > { %2291 = vmatprep.subr.bf16.mxu1 %v2499_v20 }
 0x150   : > { %2292 = vmatpush3.bf16.msra.mxu1 %v2499_v20 }
 0x1e1   : > { %v2233_v21 = vpop.f32.mrf.mxu1 }
 0x1e2   : > { %v842_v27 = vadd.f32 %v2233_v21, %v2014_v23  ;;  %v2500_v21 = vld [vmem:[%s3217_s7] sm:$0xff]  }
 0x1e3   : > { %v833_v22 = vpop.f32.mrf.mxu1  ;;  %2293 = vmatprep.subr.bf16.mxu1 %v2500_v21 }
 0x1e4   : > { %v834_v25 = vadd.f32 %v2014_v23, %v833_v22  ;;  %v898_v34 = vmax.f32 %v842_v27, 0.0  ;;  %2294 = vmatpush3.bf16.msra.mxu1 %v2500_v21  ;;  %v2501_v22 = vld [vmem:[#allocation5 + $0x38] sm:$0xff]   ;;  %v3071_v27 = vld [vmem:[%s3216_s6] ss:$0 sm:$0xff] }
 0x1e5   : > { %v2234_v24 = vpop.f32.mrf.mxu1  ;;  %2311 = vmatprep.subr.bf16.mxu0 %v2501_v22 }
 0x1e6   : > { %v845_v26 = vadd.f32 %v2234_v24, %v2014_v23  ;;  %v896_v32 = vmax.f32 %v834_v25, 0.0  ;;  %v2503_v24 = vld [vmem:[#allocation5 + $0x28] sm:$0xff]   ;;  %v2504_v25 = vld [vmem:[#allocation5 + $0x20] sm:$0xff]  }
 0x1e7   : > { %v836_v28 = vpop.f32.mrf.mxu1 }
 0x1e8   : > { %v837_v29 = vadd.f32 %v2014_v23, %v836_v28  ;;  %v899_v30 = vmax.f32 %v845_v26, 0.0  ;;  %v2505_v26 = vld [vmem:[#allocation5 + $0x18] sm:$0xff]  }
 0x1e9   : > { %v2237_v31 = vpop.f32.mrf.mxu1 }
 0x1ea   : > { %v897_v33 = vmax.f32 %v837_v29, 0.0  ;;  %v930_v37 = vpack.c.bf16 %v899_v30, %v898_v34  ;;  %v858_v41 = vadd.f32 %v2237_v31, %v2014_v23 }
 0x1eb   : > { %v849_v35 = vpop.f32.mrf.mxu1 }
 0x1ec   : > { %v929_v36 = vpack.c.bf16 %v897_v33, %v896_v32  ;;  %v850_v39 = vadd.f32 %v2014_v23, %v849_v35  ;;  %v902_v48 = vmax.f32 %v858_v41, 0.0 }
 0x1ed   : > { %v2238_v38 = vpop.f32.mrf.mxu1 }
 0x1ee   : > { %v861_v40 = vadd.f32 %v2238_v38, %v2014_v23  ;;  %2263 = vmatprep.mubr.bf16.mxu0 %v929_v36  ;;  %v900_v46 = vmax.f32 %v850_v39, 0.0 }
 0x1ef   : > { %v852_v42 = vpop.f32.mrf.mxu1  ;;  %2264 = vmatmul.mubr.bf16.vlgmr.msra.gmra.mxu0 %v930_v37 }
 0x1f0   : > { %v853_v43 = vadd.f32 %v2014_v23, %v852_v42  ;;  %v903_v44 = vmax.f32 %v861_v40, 0.0  ;;  %2312 = vmatpush3.bf16.msra.mxu0 %v2501_v22 }
 0x1f1   : > { %v2241_v45 = vpop.f32.mrf.mxu1 }
 0x1f2   : > { %v901_v47 = vmax.f32 %v853_v43, 0.0  ;;  %v932_v51 = vpack.c.bf16 %v903_v44, %v902_v48  ;;  %v874_v55 = vadd.f32 %v2241_v45, %v2014_v23 }
 0x1f3   : > { %v865_v49 = vpop.f32.mrf.mxu1 }
 0x1f4   : > { %v931_v50 = vpack.c.bf16 %v901_v47, %v900_v46  ;;  %v866_v53 = vadd.f32 %v2014_v23, %v865_v49  ;;  %v906_v62 = vmax.f32 %v874_v55, 0.0 }
 0x1f5   : > { %v2242_v52 = vpop.f32.mrf.mxu1 }
 0x1f6   : > { %v877_v54 = vadd.f32 %v2242_v52, %v2014_v23  ;;  %2267 = vmatprep.mubr.bf16.mxu0 %v931_v50  ;;  %v904_v60 = vmax.f32 %v866_v53, 0.0 }
 0x1f7   : > { %v868_v56 = vpop.f32.mrf.mxu1  ;;  %2268 = vmatmul.mubr.bf16.gmra.mxu0 %v932_v51 }
 0x1f8   : > { %v869_v57 = vadd.f32 %v2014_v23, %v868_v56  ;;  %v907_v58 = vmax.f32 %v877_v54, 0.0 }
 0x1f9   : > { %v2245_v59 = vpop.f32.mrf.mxu1 }
 0x1fa   : > { %v905_v61 = vmax.f32 %v869_v57, 0.0  ;;  %v934_v1 = vpack.c.bf16 %v907_v58, %v906_v62  ;;  %v890_v5 = vadd.f32 %v2245_v59, %v2014_v23 }
 0x1fb   : > { %v881_v63 = vpop.f32.mrf.mxu1 }
 0x1fc   : > { %v933_v0 = vpack.c.bf16 %v905_v61, %v904_v60  ;;  %v882_v3 = vadd.f32 %v2014_v23, %v881_v63  ;;  %v910_v11 = vmax.f32 %v890_v5, 0.0 }
 0x1fd   : > { %v2246_v2 = vpop.f32.mrf.mxu1 }
 0x1fe   : > { %v893_v4 = vadd.f32 %v2246_v2, %v2014_v23  ;;  %2271 = vmatprep.mubr.bf16.mxu0 %v933_v0  ;;  %v908_v9 = vmax.f32 %v882_v3, 0.0 }
 0x1ff   : > { %v884_v6 = vpop.f32.mrf.mxu1  ;;  %2272 = vmatmul.mubr.bf16.gmra.mxu0 %v934_v1 }
 0x200   : > { %v885_v7 = vadd.f32 %v2014_v23, %v884_v6  ;;  %v911_v8 = vmax.f32 %v893_v4, 0.0  ;;  %v2502_v23 = vld [vmem:[#allocation5 + $0x30] sm:$0xff]  }
 0x201   : > { %2313 = vmatprep.subr.bf16.mxu0 %v2502_v23 }
 0x202   : > { %v909_v10 = vmax.f32 %v885_v7, 0.0  ;;  %v936_v13 = vpack.c.bf16 %v911_v8, %v910_v11  ;;  %2314 = vmatpush3.bf16.msra.mxu0 %v2502_v23 }
 0x203   : > { %2315 = vmatprep.subr.bf16.mxu0 %v2503_v24 }
 0x204   : > { %v935_v12 = vpack.c.bf16 %v909_v10, %v908_v9 }
 0x206   : > { %2275 = vmatprep.mubr.bf16.mxu0 %v935_v12  ;;  %2316 = vmatpush3.bf16.msra.mxu0 %v2503_v24 }
 0x207   : > { %2276 = vmatmul.mubr.bf16.gmra.mxu0 %v936_v13  ;;  %2317 = vmatprep.subr.bf16.mxu0 %v2504_v25 }
 0x20a   : > { %2318 = vmatpush3.bf16.msra.mxu0 %v2504_v25 }
 0x20b   : > { %2319 = vmatprep.subr.bf16.mxu0 %v2505_v26 }
 0x20e   : > { %2320 = vmatpush3.bf16.msra.mxu0 %v2505_v26 }
 0x2af   : > { %v2265_v28 = vpop.f32.mrf.mxu0 }
 0x2b0   : > { %v1034_v29 = vadd.f32 %v2265_v28, %v3071_v27 }
 0x2b1   : > { %v1025_v30 = vpop.f32.mrf.mxu0 }
 0x2b2   : > { %v2034_v31 = vmul.f32 -1.442695, %v1034_v29  ;;  %v1026_v32 = vadd.f32 %v3071_v27, %v1025_v30 }
 0x2b3   : > { %v2266_v33 = vpop.f32.mrf.mxu0 }
 0x2b4   : > { %2517 = vpow2.f32 %v2034_v31  ;;  %v2032_v34 = vmul.f32 -1.442695, %v1026_v32  ;;  %v1037_v35 = vadd.f32 %v2266_v33, %v3071_v27 }
 0x2b5   : > { %v1028_v36 = vpop.f32.mrf.mxu0 }
 0x2b6   : > { %2519 = vpow2.f32 %v2032_v34  ;;  %v2035_v37 = vmul.f32 -1.442695, %v1037_v35  ;;  %v1029_v38 = vadd.f32 %v3071_v27, %v1028_v36 }
 0x2b7   : > { %v2269_v39 = vpop.f32.mrf.mxu0 }
 0x2b8   : > { %2521 = vpow2.f32 %v2035_v37  ;;  %v2033_v40 = vmul.f32 -1.442695, %v1029_v38  ;;  %v1050_v41 = vadd.f32 %v2269_v39, %v3071_v27 }
 0x2b9   : > { %v1041_v42 = vpop.f32.mrf.mxu0 }
 0x2ba   : > { %2523 = vpow2.f32 %v2033_v40  ;;  %v2038_v43 = vmul.f32 -1.442695, %v1050_v41  ;;  %v1042_v44 = vadd.f32 %v3071_v27, %v1041_v42 }
 0x2bb   : > { %v2270_v45 = vpop.f32.mrf.mxu0 }
 0x2bc   : > { %2525 = vpow2.f32 %v2038_v43  ;;  %v2036_v46 = vmul.f32 -1.442695, %v1042_v44  ;;  %v1053_v47 = vadd.f32 %v2270_v45, %v3071_v27 }
 0x2bd   : > { %v1044_v48 = vpop.f32.mrf.mxu0 }
 0x2be   : > { %2527 = vpow2.f32 %v2036_v46  ;;  %v2039_v49 = vmul.f32 -1.442695, %v1053_v47  ;;  %v1045_v50 = vadd.f32 %v3071_v27, %v1044_v48 }
 0x2bf   : > { %v2273_v51 = vpop.f32.mrf.mxu0 }
 0x2c0   : > { %2529 = vpow2.f32 %v2039_v49  ;;  %v2037_v52 = vmul.f32 -1.442695, %v1045_v50  ;;  %v1066_v53 = vadd.f32 %v2273_v51, %v3071_v27 }
 0x2c1   : > { %v2518_v54 = vpop.eup %2517  ;;  %v1057_v55 = vpop.f32.mrf.mxu0 }
 0x2c2   : > { %v1138_v56 = vadd.f32 1.0, %v2518_v54  ;;  %2531 = vpow2.f32 %v2037_v52  ;;  %v2042_v57 = vmul.f32 -1.442695, %v1066_v53  ;;  %v1058_v58 = vadd.f32 %v3071_v27, %v1057_v55 }
 0x2c3   : > { %v2520_v59 = vpop.eup %2519  ;;  %v2274_v60 = vpop.f32.mrf.mxu0 }
 0x2c4   : > { %2533 = vrcp.f32 %v1138_v56  ;;  %v1136_v61 = vadd.f32 1.0, %v2520_v59  ;;  %v2040_v62 = vmul.f32 -1.442695, %v1058_v58  ;;  %v1069_v63 = vadd.f32 %v2274_v60, %v3071_v27 }
 0x2c5   : > { %v2522_v0 = vpop.eup %2521  ;;  %2535 = vpow2.f32 %v2042_v57  ;;  %v1060_v1 = vpop.f32.mrf.mxu0 }
 0x2c6   : > { %2537 = vrcp.f32 %v1136_v61  ;;  %v1139_v2 = vadd.f32 1.0, %v2522_v0  ;;  %v2043_v3 = vmul.f32 -1.442695, %v1069_v63  ;;  %v1061_v4 = vadd.f32 %v3071_v27, %v1060_v1 }
 0x2c7   : > { %v2524_v5 = vpop.eup %2523  ;;  %2539 = vpow2.f32 %v2040_v62  ;;  %v2277_v6 = vpop.f32.mrf.mxu0 }
 0x2c8   : > { %2541 = vrcp.f32 %v1139_v2  ;;  %v1137_v7 = vadd.f32 1.0, %v2524_v5  ;;  %v2041_v8 = vmul.f32 -1.442695, %v1061_v4  ;;  %v1082_v9 = vadd.f32 %v2277_v6, %v3071_v27  ;;  %v2506_v4 = vld [vmem:[#allocation5 + $0x10] sm:$0xff]   ;;  %v2507_v5 = vld [vmem:[#allocation5 + $0x8] sm:$0xff]   ;;  %v2508_v6 = vld [vmem:[#allocation5] sm:$0xff]  }
 0x2c9   : > { %v2526_v10 = vpop.eup %2525  ;;  %2543 = vpow2.f32 %v2043_v3  ;;  %v1073_v11 = vpop.f32.mrf.mxu0  ;;  %2321 = vmatprep.subr.bf16.mxu0 %v2506_v4 }
 0x2ca   : > { %2545 = vrcp.f32 %v1137_v7  ;;  %v1142_v12 = vadd.f32 1.0, %v2526_v10  ;;  %v2046_v13 = vmul.f32 -1.442695, %v1082_v9  ;;  %v1074_v14 = vadd.f32 %v3071_v27, %v1073_v11  ;;  %2322 = vmatpush3.bf16.msra.mxu0 %v2506_v4  ;;  %v2509_v7 = vld [vmem:[#allocation7 + $0x38] sm:$0xff]   ;;  %v2511_v9 = vld [vmem:[#allocation7 + $0x28] sm:$0xff]   ;;  %v2512_v10 = vld [vmem:[#allocation7 + $0x20] sm:$0xff]  }
 0x2cb   : > { %v2528_v15 = vpop.eup %2527  ;;  %2547 = vpow2.f32 %v2041_v8  ;;  %v2278_v16 = vpop.f32.mrf.mxu0  ;;  %2323 = vmatprep.subr.bf16.mxu0 %v2507_v5  ;;  %v2510_v8 = vld [vmem:[#allocation7 + $0x30] sm:$0xff]   ;;  %2375 = vmatprep.subr.bf16.mxu1 %v2509_v7  ;;  %v3110_v11 = vld [vmem:[#allocation7 + $0x18] sm:$0xff]  }
 0x2cc   : > { %2549 = vrcp.f32 %v1142_v12  ;;  %v1140_v17 = vadd.f32 1.0, %v2528_v15  ;;  %v2044_v18 = vmul.f32 -1.442695, %v1074_v14  ;;  %v1085_v19 = vadd.f32 %v2278_v16, %v3071_v27  ;;  %v2048_v14 = vld [vmem:[%s3218_s8] ss:$0 sm:$0xff] }
 0x2cd   : > { %v2530_v20 = vpop.eup %2529  ;;  %2551 = vpow2.f32 %v2046_v13  ;;  %v1076_v21 = vpop.f32.mrf.mxu0 }
 0x2ce   : > { %2553 = vrcp.f32 %v1140_v17  ;;  %v1143_v22 = vadd.f32 1.0, %v2530_v20  ;;  %v2047_v23 = vmul.f32 -1.442695, %v1085_v19  ;;  %v1077_v24 = vadd.f32 %v3071_v27, %v1076_v21  ;;  %2324 = vmatpush3.bf16.msra.mxu0 %v2507_v5  ;;  %v2514_v5 = vld [vmem:[#allocation7 + $0x10] sm:$0xff]  }
 0x2cf   : > { %v2532_v25 = vpop.eup %2531  ;;  %2555 = vpow2.f32 %v2044_v18  ;;  %2325 = vmatprep.subr.bf16.mxu0 %v2508_v6 }
 0x2d0   : > { %2557 = vrcp.f32 %v1143_v22  ;;  %v1141_v26 = vadd.f32 1.0, %v2532_v25  ;;  %v2045_v28 = vmul.f32 -1.442695, %v1077_v24 }
 0x2d1   : > { %v2534_v29 = vpop.eup %2533  ;;  %2559 = vpow2.f32 %v2047_v23 }
 0x2d2   : > { %v2536_v30 = vpop.eup %2535  ;;  %1842 = vst [vmem:[%s3092_s23 + $0x20] sm:$0xff] %v2534_v29  ;;  %2561 = vrcp.f32 %v1141_v26  ;;  %2326 = vmatpush3.bf16.msra.mxu0 %v2508_v6  ;;  %v2515_v6 = vld [vmem:[#allocation7 + $0x8] sm:$0xff]  }
 0x2d3   : > { %v2538_v31 = vpop.eup %2537  ;;  %v1146_v32 = vadd.f32 1.0, %v2536_v30  ;;  %2563 = vpow2.f32 %v2045_v28  ;;  %2343 = vmatprep.subr.bf16.mxu0 %v2509_v7 }
 0x2d4   : > { %v2540_v27 = vpop.eup %2539  ;;  %1840 = vst [vmem:[%s3092_s23] sm:$0xff] %v2538_v31 }
 0x2d5   : > { %v2542_v33 = vpop.eup %2541  ;;  %2565 = vrcp.f32 %v1146_v32  ;;  %v1144_v34 = vadd.f32 1.0, %v2540_v27 }
 0x2d6   : > { %v2544_v35 = vpop.eup %2543  ;;  %1843 = vst [vmem:[%s3092_s23 + $0x30] sm:$0xff] %v2542_v33  ;;  %v1202_v42 = vpack.c.bf16 %v2542_v33, %v2534_v29 }
 0x2d7   : > { %v2546_v36 = vpop.eup %2545  ;;  %2567 = vrcp.f32 %v1144_v34  ;;  %v1147_v37 = vadd.f32 1.0, %v2544_v35 }
 0x2d8   : > { %v2548_v38 = vpop.eup %2547  ;;  %1841 = vst [vmem:[%s3092_s23 + $0x10] sm:$0xff] %v2546_v36  ;;  %v1201_v39 = vpack.c.bf16 %v2546_v36, %v2538_v31 }
 0x2d9   : > { %v2550_v40 = vpop.eup %2549  ;;  %2569 = vrcp.f32 %v1147_v37  ;;  %v1145_v41 = vadd.f32 1.0, %v2548_v38 }
 0x2da   : > { %v2552_v43 = vpop.eup %2551  ;;  %1846 = vst [vmem:[%s3092_s23 + $0x60] sm:$0xff] %v2550_v40  ;;  %2295 = vmatprep.mubr.bf16.mxu1 %v1201_v39 }
 0x2db   : > { %v2554_v44 = vpop.eup %2553  ;;  %2571 = vrcp.f32 %v1145_v41  ;;  %v1150_v45 = vadd.f32 1.0, %v2552_v43  ;;  %2296 = vmatmul.mubr.bf16.vlgmr.msra.gmra.mxu1 %v1202_v42 }
 0x2dc   : > { %v2556_v46 = vpop.eup %2555  ;;  %1844 = vst [vmem:[%s3092_s23 + $0x40] sm:$0xff] %v2554_v44  ;;  %2383 = vmatpush3.bf16.msra.mxu1 %v2509_v7 }
 0x2dd   : > { %v2558_v47 = vpop.eup %2557  ;;  %2573 = vrcp.f32 %v1150_v45  ;;  %v1148_v48 = vadd.f32 1.0, %v2556_v46  ;;  %2376 = vmatprep.subr.bf16.mxu1 %v2510_v8 }
 0x2de   : > { %v2560_v49 = vpop.eup %2559  ;;  %1847 = vst [vmem:[%s3092_s23 + $0x70] sm:$0xff] %v2558_v47  ;;  %v1204_v55 = vpack.c.bf16 %v2558_v47, %v2550_v40 }
 0x2df   : > { %v2562_v50 = vpop.eup %2561  ;;  %2575 = vrcp.f32 %v1148_v48  ;;  %v1151_v51 = vadd.f32 1.0, %v2560_v49 }
 0x2e0   : > { %v2564_v52 = vpop.eup %2563  ;;  %1845 = vst [vmem:[%s3092_s23 + $0x50] sm:$0xff] %v2562_v50  ;;  %v1203_v53 = vpack.c.bf16 %v2562_v50, %v2554_v44  ;;  %2384 = vmatpush3.bf16.msra.mxu1 %v2510_v8 }
 0x2e1   : > { %2577 = vrcp.f32 %v1151_v51  ;;  %v1149_v54 = vadd.f32 1.0, %v2564_v52  ;;  %2377 = vmatprep.subr.bf16.mxu1 %v2511_v9 }
 0x2e2   : > { %v2566_v56 = vpop.eup %2565  ;;  %2299 = vmatprep.mubr.bf16.mxu1 %v1203_v53 }
 0x2e3   : > { %1850 = vst [vmem:[%s3092_s23 + $0xa0] sm:$0xff] %v2566_v56  ;;  %2579 = vrcp.f32 %v1149_v54  ;;  %2300 = vmatmul.mubr.bf16.gmra.mxu1 %v1204_v55 }
 0x2e4   : > { %v2568_v57 = vpop.eup %2567  ;;  %2385 = vmatpush3.bf16.msra.mxu1 %v2511_v9 }
 0x2e5   : > { %1848 = vst [vmem:[%s3092_s23 + $0x80] sm:$0xff] %v2568_v57  ;;  %2378 = vmatprep.subr.bf16.mxu1 %v2512_v10 }
 0x2e6   : > { %v2570_v58 = vpop.eup %2569 }
 0x2e7   : > { %1851 = vst [vmem:[%s3092_s23 + $0xb0] sm:$0xff] %v2570_v58  ;;  %v1206_v62 = vpack.c.bf16 %v2570_v58, %v2566_v56 }
 0x2e8   : > { %v2572_v59 = vpop.eup %2571  ;;  %2386 = vmatpush3.bf16.msra.mxu1 %v2512_v10 }
 0x2e9   : > { %1849 = vst [vmem:[%s3092_s23 + $0x90] sm:$0xff] %v2572_v59  ;;  %v1205_v60 = vpack.c.bf16 %v2572_v59, %v2568_v57  ;;  %2379 = vmatprep.subr.bf16.mxu1 %v3110_v11 }
 0x2ea   : > { %v2574_v61 = vpop.eup %2573 }
 0x2eb   : > { %1854 = vst [vmem:[%s3092_s23 + $0xe0] sm:$0xff] %v2574_v61  ;;  %2303 = vmatprep.mubr.bf16.mxu1 %v1205_v60 }
 0x2ec   : > { %v2576_v63 = vpop.eup %2575  ;;  %2304 = vmatmul.mubr.bf16.gmra.mxu1 %v1206_v62 }
 0x2ed   : > { %1852 = vst [vmem:[%s3092_s23 + $0xc0] sm:$0xff] %v2576_v63  ;;  %2387 = vmatpush3.bf16.msra.mxu1 %v3110_v11 }
 0x2ee   : > { %v2578_v0 = vpop.eup %2577  ;;  %2380 = vmatprep.subr.bf16.mxu1 %v2514_v5 }
 0x2ef   : > { %1855 = vst [vmem:[%s3092_s23 + $0xf0] sm:$0xff] %v2578_v0  ;;  %v1208_v3 = vpack.c.bf16 %v2578_v0, %v2574_v61 }
 0x2f0   : > { %v2580_v1 = vpop.eup %2579 }
 0x2f1   : > { %1853 = vst [vmem:[%s3092_s23 + $0xd0] sm:$0xff] %v2580_v1  ;;  %v1207_v2 = vpack.c.bf16 %v2580_v1, %v2576_v63  ;;  %2388 = vmatpush3.bf16.msra.mxu1 %v2514_v5 }
 0x2f2   : > { %2381 = vmatprep.subr.bf16.mxu1 %v2515_v6 }
 0x2f3   : > { %2307 = vmatprep.mubr.bf16.mxu1 %v1207_v2 }
 0x2f4   : > { %2308 = vmatmul.mubr.bf16.gmra.mxu1 %v1208_v3 }
 0x2f5   : > { %2389 = vmatpush3.bf16.msra.mxu1 %v2515_v6 }
 0x39b   : > { %v2297_v12 = vpop.f32.mrf.mxu1 }
 0x39c   : > { %v1306_v18 = vadd.f32 %v2297_v12, %v2048_v14 }
 0x39d   : > { %v1297_v13 = vpop.f32.mrf.mxu1 }
 0x39e   : > { %v1298_v16 = vadd.f32 %v2048_v14, %v1297_v13  ;;  %v1362_v25 = vmax.f32 %v1306_v18, 0.0 }
 0x39f   : > { %v2298_v15 = vpop.f32.mrf.mxu1 }
 0x3a0   : > { %v1309_v17 = vadd.f32 %v2298_v15, %v2048_v14  ;;  %v1360_v23 = vmax.f32 %v1298_v16, 0.0 }
 0x3a1   : > { %v1300_v19 = vpop.f32.mrf.mxu1 }
 0x3a2   : > { %v1301_v20 = vadd.f32 %v2048_v14, %v1300_v19  ;;  %v1363_v21 = vmax.f32 %v1309_v17, 0.0 }
 0x3a3   : > { %v2301_v22 = vpop.f32.mrf.mxu1 }
 0x3a4   : > { %v1361_v24 = vmax.f32 %v1301_v20, 0.0  ;;  %v1394_v29 = vpack.c.bf16 %v1363_v21, %v1362_v25  ;;  %v1322_v27 = vadd.f32 %v2301_v22, %v2048_v14 }
 0x3a5   : > { %v1313_v26 = vpop.f32.mrf.mxu1 }
 0x3a6   : > { %v1393_v28 = vpack.c.bf16 %v1361_v24, %v1360_v23  ;;  %v1314_v31 = vadd.f32 %v2048_v14, %v1313_v26  ;;  %v1366_v39 = vmax.f32 %v1322_v27, 0.0 }
 0x3a7   : > { %v2302_v30 = vpop.f32.mrf.mxu1 }
 0x3a8   : > { %v1325_v32 = vadd.f32 %v2302_v30, %v2048_v14  ;;  %2327 = vmatprep.mubr.bf16.mxu0 %v1393_v28  ;;  %v1364_v36 = vmax.f32 %v1314_v31, 0.0 }
 0x3a9   : > { %v1316_v33 = vpop.f32.mrf.mxu1  ;;  %2328 = vmatmul.mubr.bf16.vlgmr.msra.gmra.mxu0 %v1394_v29 }
 0x3aa   : > { %v1317_v34 = vadd.f32 %v2048_v14, %v1316_v33  ;;  %2344 = vmatpush3.bf16.msra.mxu0 %v2509_v7  ;;  %v1367_v35 = vmax.f32 %v1325_v32, 0.0  ;;  %v2516_v7 = vld [vmem:[#allocation7] sm:$0xff]  }
 0x3ab   : > { %2345 = vmatprep.subr.bf16.mxu0 %v2510_v8  ;;  %2382 = vmatprep.subr.bf16.mxu1 %v2516_v7 }
 0x3ac   : > { %v1365_v37 = vmax.f32 %v1317_v34, 0.0  ;;  %v2305_v38 = vpop.f32.mrf.mxu1  ;;  %v1396_v42 = vpack.c.bf16 %v1367_v35, %v1366_v39  ;;  %2390 = vmatpush3.bf16.msra.mxu1 %v2516_v7 }
 0x3ad   : > { %v1338_v46 = vadd.f32 %v2305_v38, %v2048_v14 }
 0x3ae   : > { %v1395_v40 = vpack.c.bf16 %v1365_v37, %v1364_v36  ;;  %v1329_v41 = vpop.f32.mrf.mxu1  ;;  %2346 = vmatpush3.bf16.msra.mxu0 %v2510_v8 }
 0x3af   : > { %2347 = vmatprep.subr.bf16.mxu0 %v2511_v9  ;;  %v1330_v44 = vadd.f32 %v2048_v14, %v1329_v41  ;;  %v1370_v53 = vmax.f32 %v1338_v46, 0.0 }
 0x3b0   : > { %v2306_v43 = vpop.f32.mrf.mxu1  ;;  %2331 = vmatprep.mubr.bf16.mxu0 %v1395_v40 }
 0x3b1   : > { %v1341_v45 = vadd.f32 %v2306_v43, %v2048_v14  ;;  %2332 = vmatmul.mubr.bf16.gmra.mxu0 %v1396_v42  ;;  %v1368_v51 = vmax.f32 %v1330_v44, 0.0 }
 0x3b2   : > { %v1332_v47 = vpop.f32.mrf.mxu1  ;;  %2348 = vmatpush3.bf16.msra.mxu0 %v2511_v9 }
 0x3b3   : > { %v1333_v48 = vadd.f32 %v2048_v14, %v1332_v47  ;;  %2349 = vmatprep.subr.bf16.mxu0 %v2512_v10  ;;  %v1371_v49 = vmax.f32 %v1341_v45, 0.0 }
 0x3b4   : > { %v2309_v50 = vpop.f32.mrf.mxu1 }
 0x3b5   : > { %v1369_v52 = vmax.f32 %v1333_v48, 0.0  ;;  %v1398_v56 = vpack.c.bf16 %v1371_v49, %v1370_v53  ;;  %v1354_v60 = vadd.f32 %v2309_v50, %v2048_v14 }
 0x3b6   : > { %v1345_v54 = vpop.f32.mrf.mxu1  ;;  %2350 = vmatpush3.bf16.msra.mxu0 %v2512_v10  ;;  %v2057_v10 = vld [vmem:[%s3220_s10] ss:$0 sm:$0xff] }
 0x3b7   : > { %v1397_v55 = vpack.c.bf16 %v1369_v52, %v1368_v51  ;;  %2351 = vmatprep.subr.bf16.mxu0 %v3110_v11  ;;  %v1346_v58 = vadd.f32 %v2048_v14, %v1345_v54  ;;  %v1374_v2 = vmax.f32 %v1354_v60, 0.0 }
 0x3b8   : > { %v2310_v57 = vpop.f32.mrf.mxu1 }
 0x3b9   : > { %v1357_v59 = vadd.f32 %v2310_v57, %v2048_v14  ;;  %2335 = vmatprep.mubr.bf16.mxu0 %v1397_v55  ;;  %v1372_v0 = vmax.f32 %v1346_v58, 0.0 }
 0x3ba   : > { %v1348_v61 = vpop.f32.mrf.mxu1  ;;  %2336 = vmatmul.mubr.bf16.gmra.mxu0 %v1398_v56 }
 0x3bb   : > { %v1349_v62 = vadd.f32 %v2048_v14, %v1348_v61  ;;  %2352 = vmatpush3.bf16.msra.mxu0 %v3110_v11  ;;  %v1375_v63 = vmax.f32 %v1357_v59, 0.0 }
 0x3bc   : > { %2353 = vmatprep.subr.bf16.mxu0 %v2514_v5 }
 0x3bd   : > { %v1373_v1 = vmax.f32 %v1349_v62, 0.0  ;;  %v1400_v4 = vpack.c.bf16 %v1375_v63, %v1374_v2 }
 0x3bf   : > { %v1399_v3 = vpack.c.bf16 %v1373_v1, %v1372_v0  ;;  %2354 = vmatpush3.bf16.msra.mxu0 %v2514_v5  ;;  %v3125_v1 = vld [vmem:[%s3222_s12] ss:$0 sm:$0xff] }
 0x3c0   : > { %2355 = vmatprep.subr.bf16.mxu0 %v2515_v6 }
 0x3c1   : > { %2339 = vmatprep.mubr.bf16.mxu0 %v1399_v3 }
 0x3c2   : > { %2340 = vmatmul.mubr.bf16.gmra.mxu0 %v1400_v4 }
 0x3c3   : > { %2356 = vmatpush3.bf16.msra.mxu0 %v2515_v6 }
 0x3c4   : > { %2357 = vmatprep.subr.bf16.mxu0 %v2516_v7 }
 0x3c7   : > { %2358 = vmatpush3.bf16.msra.mxu0 %v2516_v7 }
 0x469   : > { %v2329_v8 = vpop.f32.mrf.mxu0 }
 0x46a   : > { %v1498_v14 = vadd.f32 %v2329_v8, %v2057_v10 }
 0x46b   : > { %v1489_v9 = vpop.f32.mrf.mxu0 }
 0x46c   : > { %v1490_v12 = vadd.f32 %v2057_v10, %v1489_v9  ;;  %v1554_v21 = vmax.f32 %v1498_v14, 0.0 }
 0x46d   : > { %v2330_v11 = vpop.f32.mrf.mxu0 }
 0x46e   : > { %v1501_v13 = vadd.f32 %v2330_v11, %v2057_v10  ;;  %v1552_v19 = vmax.f32 %v1490_v12, 0.0 }
 0x46f   : > { %v1492_v15 = vpop.f32.mrf.mxu0 }
 0x470   : > { %v1493_v16 = vadd.f32 %v2057_v10, %v1492_v15  ;;  %v1555_v17 = vmax.f32 %v1501_v13, 0.0 }
 0x471   : > { %v2333_v18 = vpop.f32.mrf.mxu0 }
 0x472   : > { %v1553_v20 = vmax.f32 %v1493_v16, 0.0  ;;  %v1586_v24 = vpack.c.bf16 %v1555_v17, %v1554_v21  ;;  %v1514_v29 = vadd.f32 %v2333_v18, %v2057_v10 }
 0x473   : > { %v1505_v22 = vpop.f32.mrf.mxu0 }
 0x474   : > { %v1585_v23 = vpack.c.bf16 %v1553_v20, %v1552_v19  ;;  %v1506_v26 = vadd.f32 %v2057_v10, %v1505_v22  ;;  %v1558_v35 = vmax.f32 %v1514_v29, 0.0 }
 0x475   : > { %v2334_v25 = vpop.f32.mrf.mxu0 }
 0x476   : > { %v1517_v28 = vadd.f32 %v2334_v25, %v2057_v10  ;;  %2359 = vmatprep.mubr.bf16.mxu0 %v1585_v23  ;;  %v1556_v27 = vmax.f32 %v1506_v26, 0.0 }
 0x477   : > { %v1508_v30 = vpop.f32.mrf.mxu0  ;;  %2360 = vmatmul.mubr.bf16.vlgmr.msra.gmra.mxu0 %v1586_v24 }
 0x478   : > { %v1509_v31 = vadd.f32 %v2057_v10, %v1508_v30  ;;  %v1559_v32 = vmax.f32 %v1517_v28, 0.0 }
 0x47a   : > { %v1557_v33 = vmax.f32 %v1509_v31, 0.0  ;;  %v2337_v34 = vpop.f32.mrf.mxu0  ;;  %v1588_v38 = vpack.c.bf16 %v1559_v32, %v1558_v35 }
 0x47b   : > { %v1530_v42 = vadd.f32 %v2337_v34, %v2057_v10 }
 0x47c   : > { %v1587_v36 = vpack.c.bf16 %v1557_v33, %v1556_v27  ;;  %v1521_v37 = vpop.f32.mrf.mxu0 }
 0x47d   : > { %v1522_v40 = vadd.f32 %v2057_v10, %v1521_v37  ;;  %v1562_v49 = vmax.f32 %v1530_v42, 0.0 }
 0x47e   : > { %v2338_v39 = vpop.f32.mrf.mxu0  ;;  %2363 = vmatprep.mubr.bf16.mxu1 %v1587_v36 }
 0x47f   : > { %v1533_v41 = vadd.f32 %v2338_v39, %v2057_v10  ;;  %2364 = vmatmul.mubr.bf16.vlgmr.msra.gmra.mxu1 %v1588_v38  ;;  %v1560_v47 = vmax.f32 %v1522_v40, 0.0 }
 0x480   : > { %v1524_v43 = vpop.f32.mrf.mxu0 }
 0x481   : > { %v1525_v44 = vadd.f32 %v2057_v10, %v1524_v43  ;;  %v1563_v45 = vmax.f32 %v1533_v41, 0.0 }
 0x482   : > { %v2341_v46 = vpop.f32.mrf.mxu0 }
 0x483   : > { %v1561_v48 = vmax.f32 %v1525_v44, 0.0  ;;  %v1590_v52 = vpack.c.bf16 %v1563_v45, %v1562_v49  ;;  %v1546_v56 = vadd.f32 %v2341_v46, %v2057_v10 }
 0x484   : > { %v1537_v50 = vpop.f32.mrf.mxu0 }
 0x485   : > { %v1589_v51 = vpack.c.bf16 %v1561_v48, %v1560_v47  ;;  %v1538_v54 = vadd.f32 %v2057_v10, %v1537_v50  ;;  %v1566_v62 = vmax.f32 %v1546_v56, 0.0 }
 0x486   : > { %v2342_v53 = vpop.f32.mrf.mxu0 }
 0x487   : > { %v1549_v55 = vadd.f32 %v2342_v53, %v2057_v10  ;;  %2367 = vmatprep.mubr.bf16.mxu1 %v1589_v51  ;;  %v1564_v60 = vmax.f32 %v1538_v54, 0.0 }
 0x488   : > { %v1540_v57 = vpop.f32.mrf.mxu0  ;;  %2368 = vmatmul.mubr.bf16.gmra.mxu1 %v1590_v52 }
 0x489   : > { %v1541_v58 = vadd.f32 %v2057_v10, %v1540_v57  ;;  %v1567_v59 = vmax.f32 %v1549_v55, 0.0 }
 0x48b   : > { %v1565_v61 = vmax.f32 %v1541_v58, 0.0  ;;  %v1592_v0 = vpack.c.bf16 %v1567_v59, %v1566_v62 }
 0x48d   : > { %v1591_v63 = vpack.c.bf16 %v1565_v61, %v1564_v60 }
 0x48f   : > { %2371 = vmatprep.mubr.bf16.mxu1 %v1591_v63 }
 0x490   : > { %2372 = vmatmul.mubr.bf16.gmra.mxu1 %v1592_v0 }
 0x537   : > { %v2361_v2 = vpop.f32.mrf.mxu0 }
 0x538   : > { %v1690_v3 = vadd.f32 %v2361_v2, %v3125_v1 }
 0x539   : > { %v1681_v4 = vpop.f32.mrf.mxu0 }
 0x53a   : > { %v2077_v5 = vmul.f32 -1.442695, %v1690_v3  ;;  %v1682_v6 = vadd.f32 %v3125_v1, %v1681_v4 }
 0x53b   : > { %v2362_v7 = vpop.f32.mrf.mxu0 }
 0x53c   : > { %2581 = vpow2.f32 %v2077_v5  ;;  %v2075_v8 = vmul.f32 -1.442695, %v1682_v6  ;;  %v1693_v9 = vadd.f32 %v2362_v7, %v3125_v1 }
 0x53d   : > { %v1684_v10 = vpop.f32.mrf.mxu0 }
 0x53e   : > { %2583 = vpow2.f32 %v2075_v8  ;;  %v2078_v11 = vmul.f32 -1.442695, %v1693_v9  ;;  %v1685_v12 = vadd.f32 %v3125_v1, %v1684_v10 }
 0x53f   : > { %v2365_v13 = vpop.f32.mrf.mxu1 }
 0x540   : > { %2585 = vpow2.f32 %v2078_v11  ;;  %v2076_v14 = vmul.f32 -1.442695, %v1685_v12  ;;  %v1706_v15 = vadd.f32 %v2365_v13, %v3125_v1 }
 0x541   : > { %v1697_v16 = vpop.f32.mrf.mxu1 }
 0x542   : > { %2587 = vpow2.f32 %v2076_v14  ;;  %v2081_v17 = vmul.f32 -1.442695, %v1706_v15  ;;  %v1698_v18 = vadd.f32 %v3125_v1, %v1697_v16 }
 0x543   : > { %v2366_v19 = vpop.f32.mrf.mxu1 }
 0x544   : > { %2589 = vpow2.f32 %v2081_v17  ;;  %v2079_v20 = vmul.f32 -1.442695, %v1698_v18  ;;  %v1709_v21 = vadd.f32 %v2366_v19, %v3125_v1 }
 0x545   : > { %v1700_v22 = vpop.f32.mrf.mxu1 }
 0x546   : > { %2591 = vpow2.f32 %v2079_v20  ;;  %v2082_v23 = vmul.f32 -1.442695, %v1709_v21  ;;  %v1701_v24 = vadd.f32 %v3125_v1, %v1700_v22 }
 0x548   : > { %2593 = vpow2.f32 %v2082_v23  ;;  %v2080_v25 = vmul.f32 -1.442695, %v1701_v24  ;;  %v2369_v26 = vpop.f32.mrf.mxu1 }
 0x549   : > { %v2582_v28 = vpop.eup %2581  ;;  %v1722_v29 = vadd.f32 %v2369_v26, %v3125_v1 }
 0x54a   : > { %v1794_v30 = vadd.f32 1.0, %v2582_v28  ;;  %2595 = vpow2.f32 %v2080_v25  ;;  %v1713_v31 = vpop.f32.mrf.mxu1 }
 0x54b   : > { %v2584_v32 = vpop.eup %2583  ;;  %v2085_v27 = vmul.f32 -1.442695, %v1722_v29  ;;  %v1714_v33 = vadd.f32 %v3125_v1, %v1713_v31 }
 0x54c   : > { %2597 = vrcp.f32 %v1794_v30  ;;  %v1792_v34 = vadd.f32 1.0, %v2584_v32  ;;  %v2370_v35 = vpop.f32.mrf.mxu1 }
 0x54d   : > { %v2586_v36 = vpop.eup %2585  ;;  %2599 = vpow2.f32 %v2085_v27  ;;  %v2083_v37 = vmul.f32 -1.442695, %v1714_v33  ;;  %v1725_v38 = vadd.f32 %v2370_v35, %v3125_v1 }
 0x54e   : > { %2601 = vrcp.f32 %v1792_v34  ;;  %v1795_v39 = vadd.f32 1.0, %v2586_v36  ;;  %v1716_v40 = vpop.f32.mrf.mxu1 }
 0x54f   : > { %v2588_v41 = vpop.eup %2587  ;;  %2603 = vpow2.f32 %v2083_v37  ;;  %v2086_v42 = vmul.f32 -1.442695, %v1725_v38  ;;  %v1717_v43 = vadd.f32 %v3125_v1, %v1716_v40 }
 0x550   : > { %2605 = vrcp.f32 %v1795_v39  ;;  %v1793_v44 = vadd.f32 1.0, %v2588_v41  ;;  %v2373_v45 = vpop.f32.mrf.mxu1 }
 0x551   : > { %v2590_v46 = vpop.eup %2589  ;;  %2607 = vpow2.f32 %v2086_v42  ;;  %v2084_v47 = vmul.f32 -1.442695, %v1717_v43  ;;  %v1738_v48 = vadd.f32 %v2373_v45, %v3125_v1 }
 0x552   : > { %2609 = vrcp.f32 %v1793_v44  ;;  %v1798_v49 = vadd.f32 1.0, %v2590_v46  ;;  %v1729_v50 = vpop.f32.mrf.mxu1 }
 0x553   : > { %v2592_v51 = vpop.eup %2591  ;;  %2611 = vpow2.f32 %v2084_v47  ;;  %v2089_v52 = vmul.f32 -1.442695, %v1738_v48  ;;  %v1730_v53 = vadd.f32 %v3125_v1, %v1729_v50 }
 0x554   : > { %2613 = vrcp.f32 %v1798_v49  ;;  %v1796_v54 = vadd.f32 1.0, %v2592_v51  ;;  %v2374_v55 = vpop.f32.mrf.mxu1 }
 0x555   : > { %v2594_v56 = vpop.eup %2593  ;;  %2615 = vpow2.f32 %v2089_v52  ;;  %v2087_v57 = vmul.f32 -1.442695, %v1730_v53  ;;  %v1741_v58 = vadd.f32 %v2374_v55, %v3125_v1 }
 0x556   : > { %2617 = vrcp.f32 %v1796_v54  ;;  %v1799_v59 = vadd.f32 1.0, %v2594_v56  ;;  %v1732_v60 = vpop.f32.mrf.mxu1 }
 0x557   : > { %v2596_v61 = vpop.eup %2595  ;;  %2619 = vpow2.f32 %v2087_v57  ;;  %v2090_v62 = vmul.f32 -1.442695, %v1741_v58  ;;  %v1733_v63 = vadd.f32 %v3125_v1, %v1732_v60 }
 0x558   : > { %2621 = vrcp.f32 %v1799_v59  ;;  %v1797_v0 = vadd.f32 1.0, %v2596_v61 }
 0x559   : > { %v2598_v2 = vpop.eup %2597  ;;  %2623 = vpow2.f32 %v2090_v62  ;;  %v2088_v3 = vmul.f32 -1.442695, %v1733_v63 }
 0x55a   : > { %v2600_v4 = vpop.eup %2599  ;;  %1858 = vst [vmem:[%s3092_s23 + $0x28] sm:$0xff] %v2598_v2  ;;  %2625 = vrcp.f32 %v1797_v0 }
 0x55b   : > { %v2602_v5 = vpop.eup %2601  ;;  %v1802_v6 = vadd.f32 1.0, %v2600_v4  ;;  %2627 = vpow2.f32 %v2088_v3 }
 0x55c   : > { %v2604_v7 = vpop.eup %2603  ;;  %1856 = vst [vmem:[%s3092_s23 + $0x8] sm:$0xff] %v2602_v5 }
 0x55d   : > { %v2606_v8 = vpop.eup %2605  ;;  %2629 = vrcp.f32 %v1802_v6  ;;  %v1800_v9 = vadd.f32 1.0, %v2604_v7 }
 0x55e   : > { %v2608_v1 = vpop.eup %2607  ;;  %1859 = vst [vmem:[%s3092_s23 + $0x38] sm:$0xff] %v2606_v8 }
 0x55f   : > { %v2610_v10 = vpop.eup %2609  ;;  %2631 = vrcp.f32 %v1800_v9  ;;  %v1803_v11 = vadd.f32 1.0, %v2608_v1 }
 0x560   : > { %v2612_v12 = vpop.eup %2611  ;;  %1857 = vst [vmem:[%s3092_s23 + $0x18] sm:$0xff] %v2610_v10 }
 0x561   : > { %v2614_v13 = vpop.eup %2613  ;;  %2633 = vrcp.f32 %v1803_v11  ;;  %v1801_v14 = vadd.f32 1.0, %v2612_v12 }
 0x562   : > { %v2616_v15 = vpop.eup %2615  ;;  %1862 = vst [vmem:[%s3092_s23 + $0x68] sm:$0xff] %v2614_v13 }
 0x563   : > { %v2618_v16 = vpop.eup %2617  ;;  %2635 = vrcp.f32 %v1801_v14  ;;  %v1806_v17 = vadd.f32 1.0, %v2616_v15 }
 0x564   : > { %v2620_v18 = vpop.eup %2619  ;;  %1860 = vst [vmem:[%s3092_s23 + $0x48] sm:$0xff] %v2618_v16 }
 0x565   : > { %v2622_v19 = vpop.eup %2621  ;;  %2637 = vrcp.f32 %v1806_v17  ;;  %v1804_v20 = vadd.f32 1.0, %v2620_v18 }
 0x566   : > { %v2624_v21 = vpop.eup %2623  ;;  %1863 = vst [vmem:[%s3092_s23 + $0x78] sm:$0xff] %v2622_v19 }
 0x567   : > { %v2626_v22 = vpop.eup %2625  ;;  %2639 = vrcp.f32 %v1804_v20  ;;  %v1807_v23 = vadd.f32 1.0, %v2624_v21 }
 0x568   : > { %v2628_v24 = vpop.eup %2627  ;;  %1861 = vst [vmem:[%s3092_s23 + $0x58] sm:$0xff] %v2626_v22 }
 0x569   : > { %2641 = vrcp.f32 %v1807_v23  ;;  %v1805_v25 = vadd.f32 1.0, %v2628_v24 }
 0x56a   : > { %v2630_v26 = vpop.eup %2629 }
 0x56b   : > { %1866 = vst [vmem:[%s3092_s23 + $0xa8] sm:$0xff] %v2630_v26  ;;  %2643 = vrcp.f32 %v1805_v25 }
 0x56c   : > { %v2632_v28 = vpop.eup %2631 }
 0x56d   : > { %1864 = vst [vmem:[%s3092_s23 + $0x88] sm:$0xff] %v2632_v28 }
 0x56e   : > { %v2634_v29 = vpop.eup %2633 }
 0x56f   : > { %1867 = vst [vmem:[%s3092_s23 + $0xb8] sm:$0xff] %v2634_v29 }
 0x570   : > { %v2636_v30 = vpop.eup %2635 }
 0x571   : > { %1865 = vst [vmem:[%s3092_s23 + $0x98] sm:$0xff] %v2636_v30 }
 0x572   : > { %v2638_v31 = vpop.eup %2637 }
 0x573   : > { %1870 = vst [vmem:[%s3092_s23 + $0xe8] sm:$0xff] %v2638_v31 }
 0x574   : > { %v2640_v32 = vpop.eup %2639 }
 0x575   : > { %1868 = vst [vmem:[%s3092_s23 + $0xc8] sm:$0xff] %v2640_v32 }
 0x576   : > { %v2642_v27 = vpop.eup %2641 }
 0x577   : > { %1871 = vst [vmem:[%s3092_s23 + $0xf8] sm:$0xff] %v2642_v27 }
 0x578   : > { %v2644_v33 = vpop.eup %2643 }
 0x579   : > { %1869 = vst [vmem:[%s3092_s23 + $0xd8] sm:$0xff] %v2644_v33 }
 0x57a   : > { %2736 = shalt.err (!%p2733_p0)
}
 0x57b   : > { %s2737_s22 = scalar_lea.hbm %s3162_s20, 4096  ;;  %s2741_s27 = scalar_lea.hbm %s3223_s13, 8192 }
 0x57c   : > { %p2738_p6 = scmp.ne.s32.totalorder %s3162_s20, %s2737_s22  ;;  %p2742_p1 = scmp.lt.s32.totalorder %s3162_s20, %s3223_s13 }
 0x57d   : > { %p2743_p5 = scmp.lt.s32.totalorder %s2741_s27, %s2737_s22 }
 0x57e   : > { %p2739_p9 = pnand %p2738_p6, %p3242_p12 }
 0x57f   : > { %p2744_p3 = por %p2743_p5, %p2742_p1 }
 0x580   : > { %p2740_p13 = pneg %p2739_p9 }
 0x582   : > { %p2745_p10 = pnand %p2744_p3, %p2740_p13 }
 0x584   : > { %2748 = shalt.err (!%p2745_p10)
}
 0x585   : > { %s2799_s29 = smov 256   ;;  %s2800_s21 = smov 16  }
 0x586   : > { %2403 = dma.vmem_to_hbm [thread:$0]  (%p3242_p12), %s3164_s16, 4096, %s3162_s20, %s3170_s30, %s2799_s29, %s2799_s29, %s2800_s21  }
 0x587 PF: > { %s3243_s24 = sld [smem:[#allocation15_spill]]  ;;  %p2425_p2 = scmp.ge.s32.totalorder %s2791_s28, 2 }
 0x588   : > { %s1902_s15 = sand.u32 1, %s2779_s25  }
 0x589   : > { %s1903_s22 = scalar_lea.sflag [#allocation4], %s1902_s15 }
 0x58d   : > { %p3244_p4 = scmp.ne.s32.totalorder %s3243_s24, 0 }
 0x58f   : > { %p2416_p7 = pnand %p2425_p2, %p3244_p4 }
 0x591   : > { %p2417_p8 = pneg %p2416_p7 }
 0x593   : > { %2774 = dma.done.wait (%p2417_p8), %s1903_s22, 4096  }
 0x594   : > { %2776 = vsyncadd (%p2417_p8), %s1903_s22, 4294963200  ;;  %s3245_s28 = sld [smem:[#allocation13_spill]]  ;;  %s3248_s25 = smov %s2783_s26 }
 0x595   : > { %s3246_s23 = sld [smem:[#allocation12_spill]] }
 0x596   : > { %s3247_s27 = sld [smem:[#allocation14_spill]] }
 0x59a   : > { %p25_p11 = scmp.ge.s32.totalorder %s3245_s28, 4  }
 0x59b   : > { %s3249_s26 = smov %s3246_s23 }
 0x59c   :  { %27 = sbr.rel (!%p25_p11) target bundleno = 5 (0x5), region = 120 }
 0x5a1   :  { %1908 = vsyncpa [#allocation3], 1 }
 0x5a2   :  { %1910 = vsyncpa [#allocation3 + $0x1], 1 }
 0x5a3   :  { %1911 = vsyncpa [#allocation6], 1 }
 0x5a4   :  { %1912 = vsyncpa [#allocation4], 1 }
 0x5a5   :  { %1914 = vsyncpa [#allocation4 + $0x1], 1 }

</bundles_post_ra>
